<compile_context>
chip_gen: v6e
topology: v6e:2x2x1
jax: 0.10.0
libtpu: 0.0.40
codegen_flags: <defaults>
</compile_context>

<pallas_src>
import jax
import jax.numpy as jnp
import numpy as np
from jax import lax
from jax.experimental import pallas as pl
from jax.experimental.pallas import tpu as pltpu

CH_SCALE = 0.042    # channel_attention_scale
SP_SCALE = 0.0625   # spatial_attention_scale
KSIZE = 7
PAD = 3


def _sigmoid(x):
    # exp -> EUP; approximate reciprocal -> EUP (keeps VALU slots free).
    return pl.reciprocal(1.0 + jnp.exp(-x), approx=True)


def _attention_rotavg_kernel(x_ref, xcf_ref, w1t_ref, w2t_ref, w2tr_ref,
                             mavg_ref, mmax_ref, o_ref):
    """Fused AttentionBlock + rotation-average.

    Math used for the fusion (all verified against the pure-JAX reference):
      * mean/max over HW are invariant to the spatial flip, so both branches
        share the channel-attention MLP output `logits`.
      * xcf = flip_{C,HW}(x), so  flip_C(x1_flip) = xcf * flip_C(sc)  where
        sc is the channel scale and flip_C(sc) comes from a column-reversed
        fc2 weight.
      * mean/max over C are invariant to the channel flip, so the flipped
        branch's spatial-attention maps can be computed directly from
        flip_C(x1_flip); the same Toeplitz conv matrix applies.
      * The module flips the flipped-branch output only along C, so
        out = 0.5*(attn(x) + flip_C(attn(flip_HW(x)))) is exactly
        0.5*(ya + yb) below.
    """
    x = x_ref[...].astype(jnp.float32)        # (B, C, HW)  original orientation
    xcf = xcf_ref[...].astype(jnp.float32)    # (B, C, HW)  flipped over C and HW

    # ---------------- channel attention (spatially flip-invariant) ----------
    avg_c = jnp.mean(x, axis=2)               # (B, C)
    max_c = jnp.max(x, axis=2)                # (B, C)
    h = (jnp.maximum(jnp.dot(avg_c, w1t_ref[...],
                             preferred_element_type=jnp.float32), 0.0)
         + jnp.maximum(jnp.dot(max_c, w1t_ref[...],
                               preferred_element_type=jnp.float32), 0.0))
    logits = jnp.dot(h, w2t_ref[...], preferred_element_type=jnp.float32)    # (B, C)
    logits_r = jnp.dot(h, w2tr_ref[...], preferred_element_type=jnp.float32)  # flip_C(logits)
    sc = 1.0 + CH_SCALE * (_sigmoid(logits) - 1.0)       # (B, C)
    sc_r = 1.0 + CH_SCALE * (_sigmoid(logits_r) - 1.0)   # = flip_C(sc)

    xa = x * sc[:, :, None]                   # channel-attended original branch
    zb = xcf * sc_r[:, :, None]               # = flip_C(channel-attended flipped branch)

    # -------- spatial attention: 7x7 conv as lane-dense bf16 Toeplitz matmuls
    mavg = mavg_ref[...]                      # (HW, HW) bf16
    mmax = mmax_ref[...]                      # (HW, HW) bf16

    def spatial_scale(t):
        avg_s = jnp.mean(t, axis=1).astype(jnp.bfloat16)   # (B, HW)
        max_s = jnp.max(t, axis=1).astype(jnp.bfloat16)    # (B, HW)
        conv = (jnp.dot(avg_s, mavg, preferred_element_type=jnp.float32)
                + jnp.dot(max_s, mmax, preferred_element_type=jnp.float32))
        return 1.0 + SP_SCALE * (_sigmoid(conv) - 1.0)     # (B, HW)

    ya = xa * spatial_scale(xa)[:, None, :]   # attn(x)
    yb = zb * spatial_scale(zb)[:, None, :]   # flip_C(attn(flip_HW(x)))

    o_ref[...] = (0.5 * (ya + yb)).astype(o_ref.dtype)


def _conv7x7_toeplitz(wconv, H, W):
    """Fold a (1, 2, 7, 7) Conv2d weight (padding=3, no bias) into two
    (H*W, H*W) Toeplitz matrices (one per pooled input channel)."""
    w = np.asarray(wconv, dtype=np.float32).reshape(2, KSIZE, KSIZE)
    HW = H * W
    m = np.zeros((2, HW, HW), np.float32)
    oy, ox = np.meshgrid(np.arange(H), np.arange(W), indexing="ij")
    o_idx = (oy * W + ox).ravel()
    for c in range(2):
        for kh in range(KSIZE):
            for kw in range(KSIZE):
                iy = oy + kh - PAD
                ix = ox + kw - PAD
                valid = ((iy >= 0) & (iy < H) & (ix >= 0) & (ix < W)).ravel()
                i_idx = (np.clip(iy, 0, H - 1) * W + np.clip(ix, 0, W - 1)).ravel()
                m[c, i_idx[valid], o_idx[valid]] = w[c, kh, kw]
    return m  # (2, HW, HW)


def prepare_attention_params(w1, w2, wconv, H, W):
    """Host-side, once per model: transpose the MLP weights, build the
    Toeplitz conv matrices (bf16 for single-pass MXU), and the channel-flipped
    fc2 used by the rotation branch."""
    m = _conv7x7_toeplitz(wconv, H, W)
    w1t = jnp.asarray(w1, jnp.float32).T          # (C, C//8)
    w2t = jnp.asarray(w2, jnp.float32).T          # (C//8, C)
    w2t_rev = w2t[:, ::-1]                        # produces flip_C of the MLP output
    return dict(
        w1t=w1t, w2t=w2t, w2t_rev=w2t_rev,
        m_avg=jnp.asarray(m[0], dtype=jnp.bfloat16),   # (HW, HW)
        m_max=jnp.asarray(m[1], dtype=jnp.bfloat16),   # (HW, HW)
    )


@jax.jit
def rotation_wrapper_forward(x, params):
    """RotationWrapperModel.forward (export_mode=False), fully fused."""
    B, C, H, W = x.shape
    HW = H * W
    r = params["w1t"].shape[1]
    x_flat = x.reshape(B, C, HW)                       # lane-dense layout (HW on lanes)
    # Flipping both H and W == reversing the flattened HW axis; also flip C so
    # the kernel needs no in-kernel data reversal at all.
    xcf_flat = jnp.flip(x_flat, axis=(1, 2))

    out = pl.pallas_call(
        _attention_rotavg_kernel,
        out_shape=jax.ShapeDtypeStruct((B, C, HW), x.dtype),
        grid=(1,),                                      # single step: ~1.2 MiB << VMEM
        in_specs=[
            pl.BlockSpec((B, C, HW), lambda i: (0, 0, 0)),
            pl.BlockSpec((B, C, HW), lambda i: (0, 0, 0)),
            pl.BlockSpec((C, r), lambda i: (0, 0)),
            pl.BlockSpec((r, C), lambda i: (0, 0)),
            pl.BlockSpec((r, C), lambda i: (0, 0)),
            pl.BlockSpec((HW, HW), lambda i: (0, 0)),
            pl.BlockSpec((HW, HW), lambda i: (0, 0)),
        ],
        out_specs=pl.BlockSpec((B, C, HW), lambda i: (0, 0, 0)),
        compiler_params=pltpu.CompilerParams(
            dimension_semantics=("arbitrary",)),
    )(x_flat, xcf_flat, params["w1t"], params["w2t"], params["w2t_rev"],
      params["m_avg"], params["m_max"])
    return out.reshape(B, C, H, W)


# ----------------------------- pure-JAX reference -----------------------------
def _attention_reference(x, w1, w2, wconv):
    avg = jnp.mean(x, axis=(2, 3), keepdims=True)
    mx = jnp.max(x, axis=(2, 3), keepdims=True)

    def mlp(p):
        h = jnp.maximum(jnp.einsum('rc,bcij->brij', w1, p), 0.0)
        return jnp.einsum('cr,brij->bcij', w2, h)

    ca = jax.nn.sigmoid(mlp(avg) + mlp(mx))
    x = x * (1.0 + CH_SCALE * (ca - 1.0))
    avg_s = jnp.mean(x, axis=1, keepdims=True)
    max_s = jnp.max(x, axis=1, keepdims=True)
    inp = jnp.concatenate([avg_s, max_s], axis=1)
    conv = lax.conv_general_dilated(
        inp, wconv, window_strides=(1, 1),
        padding=((PAD, PAD), (PAD, PAD)),
        dimension_numbers=('NCHW', 'OIHW', 'NCHW'))
    sa = jax.nn.sigmoid(conv)
    return x * (1.0 + SP_SCALE * (sa - 1.0))


def reference(x, w1, w2, wconv):
    x_flip = jnp.flip(x, axis=(2, 3))
    y_flip = _attention_reference(x_flip, w1, w2, wconv)
    y = jnp.flip(y_flip, axis=1)
    return (_attention_reference(x, w1, w2, wconv) + y) / 2


if __name__ == "__main__":
    B, C, H, W = 2, 16, 16, 16          # channels // 8 == 2
    key = jax.random.PRNGKey(0)
    kx, k1, k2, k3 = jax.random.split(key, 4)

    x = jax.random.normal(kx, (B, C, H, W), dtype=jnp.float32)
    # Deterministic synthetic weights (shapes from the nn.Module __init__).
    w1 = jax.random.normal(k1, (C // 8, C), dtype=jnp.float32) * 0.2    # fc1
    w2 = jax.random.normal(k2, (C, C // 8), dtype=jnp.float32) * 0.2    # fc2
    wconv = jax.random.normal(k3, (1, 2, KSIZE, KSIZE), dtype=jnp.float32) * 0.1

    params = prepare_attention_params(w1, w2, wconv, H, W)   # host Toeplitz build: once
    out = rotation_wrapper_forward(x, params)
    jax.block_until_ready(out)

    ref = reference(x, w1, w2, wconv)
    np.testing.assert_allclose(np.asarray(out), np.asarray(ref),
                               rtol=1e-3, atol=1e-3)
    print("KERNEL_OK")
</pallas_src>

<mosaic_0001>
module attributes {stable_mosaic.version = 11 : i64} {
  func.func @_attention_rotavg_kernel(%arg0: i32, %arg1: memref<2x16x256xf32, #tpu.memory_space<vmem>>, %arg2: memref<2x16x256xf32, #tpu.memory_space<vmem>>, %arg3: memref<16x2xf32, #tpu.memory_space<vmem>>, %arg4: memref<2x16xf32, #tpu.memory_space<vmem>>, %arg5: memref<2x16xf32, #tpu.memory_space<vmem>>, %arg6: memref<256x256xbf16, #tpu.memory_space<vmem>>, %arg7: memref<256x256xbf16, #tpu.memory_space<vmem>>, %arg8: memref<2x16x256xf32, #tpu.memory_space<vmem>>) attributes {dimension_semantics = [#tpu.dimension_semantics<arbitrary>], iteration_bounds = array<i64: 1>, scalar_prefetch = 0 : i64, scratch_operands = 0 : i64, tpu.core_type = #tpu.core_type<tc>, window_params = [{pipeline_mode = #tpu.pipeline_mode<synchronous>, transform_indices = @transform_0, window_bounds = array<i64: 2, 16, 256>}, {pipeline_mode = #tpu.pipeline_mode<synchronous>, transform_indices = @transform_1, window_bounds = array<i64: 2, 16, 256>}, {pipeline_mode = #tpu.pipeline_mode<synchronous>, transform_indices = @transform_2, window_bounds = array<i64: 16, 2>}, {pipeline_mode = #tpu.pipeline_mode<synchronous>, transform_indices = @transform_3, window_bounds = array<i64: 2, 16>}, {pipeline_mode = #tpu.pipeline_mode<synchronous>, transform_indices = @transform_4, window_bounds = array<i64: 2, 16>}, {pipeline_mode = #tpu.pipeline_mode<synchronous>, transform_indices = @transform_5, window_bounds = array<i64: 256, 256>}, {pipeline_mode = #tpu.pipeline_mode<synchronous>, transform_indices = @transform_6, window_bounds = array<i64: 256, 256>}, {pipeline_mode = #tpu.pipeline_mode<synchronous>, transform_indices = @transform_7, window_bounds = array<i64: 2, 16, 256>}]} {
    %c0 = arith.constant 0 : index
    %c0_0 = arith.constant 0 : index
    %c0_1 = arith.constant 0 : index
    %0 = vector.load %arg1[%c0, %c0_0, %c0_1] : memref<2x16x256xf32, #tpu.memory_space<vmem>>, vector<2x16x256xf32>
    %c0_2 = arith.constant 0 : index
    %c0_3 = arith.constant 0 : index
    %c0_4 = arith.constant 0 : index
    %1 = vector.load %arg2[%c0_2, %c0_3, %c0_4] : memref<2x16x256xf32, #tpu.memory_space<vmem>>, vector<2x16x256xf32>
    %cst = arith.constant dense<0.000000e+00> : vector<2x16xf32>
    %2 = vector.multi_reduction <add>, %0, %cst [2] : vector<2x16x256xf32> to vector<2x16xf32>
    %cst_5 = arith.constant 2.560000e+02 : f32
    %3 = vector.broadcast %cst_5 : f32 to vector<2x16xf32>
    %4 = arith.divf %2, %3 : vector<2x16xf32>
    %cst_6 = arith.constant dense<0xFF800000> : vector<2x16xf32>
    %5 = vector.multi_reduction <maximumf>, %0, %cst_6 [2] : vector<2x16x256xf32> to vector<2x16xf32>
    %c0_7 = arith.constant 0 : index
    %c0_8 = arith.constant 0 : index
    %6 = vector.load %arg3[%c0_7, %c0_8] : memref<16x2xf32, #tpu.memory_space<vmem>>, vector<16x2xf32>
    %cst_9 = arith.constant dense<0.000000e+00> : vector<2x2xf32>
    %7 = tpu.matmul %4, %6, %cst_9 {dimension_numbers = #tpu.dot_dimension_numbers<[1], [0], [0], [1], [0, 0, 1, 1], [], []>} : vector<2x16xf32>, vector<16x2xf32>, vector<2x2xf32> -> vector<2x2xf32>
    %cst_10 = arith.constant 0.000000e+00 : f32
    %8 = vector.broadcast %cst_10 : f32 to vector<2x2xf32>
    %9 = arith.maximumf %7, %8 : vector<2x2xf32>
    %c0_11 = arith.constant 0 : index
    %c0_12 = arith.constant 0 : index
    %10 = vector.load %arg3[%c0_11, %c0_12] : memref<16x2xf32, #tpu.memory_space<vmem>>, vector<16x2xf32>
    %cst_13 = arith.constant dense<0.000000e+00> : vector<2x2xf32>
    %11 = tpu.matmul %5, %10, %cst_13 {dimension_numbers = #tpu.dot_dimension_numbers<[1], [0], [0], [1], [0, 0, 1, 1], [], []>} : vector<2x16xf32>, vector<16x2xf32>, vector<2x2xf32> -> vector<2x2xf32>
    %cst_14 = arith.constant 0.000000e+00 : f32
    %12 = vector.broadcast %cst_14 : f32 to vector<2x2xf32>
    %13 = arith.maximumf %11, %12 : vector<2x2xf32>
    %14 = arith.addf %9, %13 : vector<2x2xf32>
    %c0_15 = arith.constant 0 : index
    %c0_16 = arith.constant 0 : index
    %15 = vector.load %arg4[%c0_15, %c0_16] : memref<2x16xf32, #tpu.memory_space<vmem>>, vector<2x16xf32>
    %cst_17 = arith.constant dense<0.000000e+00> : vector<2x16xf32>
    %16 = tpu.matmul %14, %15, %cst_17 {dimension_numbers = #tpu.dot_dimension_numbers<[1], [0], [0], [1], [0, 0, 1, 1], [], []>} : vector<2x2xf32>, vector<2x16xf32>, vector<2x16xf32> -> vector<2x16xf32>
    %c0_18 = arith.constant 0 : index
    %c0_19 = arith.constant 0 : index
    %17 = vector.load %arg5[%c0_18, %c0_19] : memref<2x16xf32, #tpu.memory_space<vmem>>, vector<2x16xf32>
    %cst_20 = arith.constant dense<0.000000e+00> : vector<2x16xf32>
    %18 = tpu.matmul %14, %17, %cst_20 {dimension_numbers = #tpu.dot_dimension_numbers<[1], [0], [0], [1], [0, 0, 1, 1], [], []>} : vector<2x2xf32>, vector<2x16xf32>, vector<2x16xf32> -> vector<2x16xf32>
    %cst_21 = arith.constant 0.000000e+00 : f32
    %19 = vector.broadcast %cst_21 : f32 to vector<2x16xf32>
    %20 = arith.subf %19, %16 : vector<2x16xf32>
    %21 = math.exp %20 : vector<2x16xf32>
    %cst_22 = arith.constant 1.000000e+00 : f32
    %22 = vector.broadcast %cst_22 : f32 to vector<2x16xf32>
    %23 = arith.addf %22, %21 : vector<2x16xf32>
    %24 = tpu.reciprocal %23 {approx = true} : vector<2x16xf32> -> vector<2x16xf32>
    %cst_23 = arith.constant 1.000000e+00 : f32
    %25 = vector.broadcast %cst_23 : f32 to vector<2x16xf32>
    %26 = arith.subf %24, %25 : vector<2x16xf32>
    %cst_24 = arith.constant 4.200000e-02 : f32
    %27 = vector.broadcast %cst_24 : f32 to vector<2x16xf32>
    %28 = arith.mulf %27, %26 : vector<2x16xf32>
    %cst_25 = arith.constant 1.000000e+00 : f32
    %29 = vector.broadcast %cst_25 : f32 to vector<2x16xf32>
    %30 = arith.addf %29, %28 : vector<2x16xf32>
    %cst_26 = arith.constant 0.000000e+00 : f32
    %31 = vector.broadcast %cst_26 : f32 to vector<2x16xf32>
    %32 = arith.subf %31, %18 : vector<2x16xf32>
    %33 = math.exp %32 : vector<2x16xf32>
    %cst_27 = arith.constant 1.000000e+00 : f32
    %34 = vector.broadcast %cst_27 : f32 to vector<2x16xf32>
    %35 = arith.addf %34, %33 : vector<2x16xf32>
    %36 = tpu.reciprocal %35 {approx = true} : vector<2x16xf32> -> vector<2x16xf32>
    %cst_28 = arith.constant 1.000000e+00 : f32
    %37 = vector.broadcast %cst_28 : f32 to vector<2x16xf32>
    %38 = arith.subf %36, %37 : vector<2x16xf32>
    %cst_29 = arith.constant 4.200000e-02 : f32
    %39 = vector.broadcast %cst_29 : f32 to vector<2x16xf32>
    %40 = arith.mulf %39, %38 : vector<2x16xf32>
    %cst_30 = arith.constant 1.000000e+00 : f32
    %41 = vector.broadcast %cst_30 : f32 to vector<2x16xf32>
    %42 = arith.addf %41, %40 : vector<2x16xf32>
    %43 = vector.shape_cast %30 : vector<2x16xf32> to vector<2x16x1xf32>
    %44 = vector.broadcast %43 : vector<2x16x1xf32> to vector<2x16x256xf32>
    %45 = arith.mulf %0, %44 : vector<2x16x256xf32>
    %46 = vector.shape_cast %42 : vector<2x16xf32> to vector<2x16x1xf32>
    %47 = vector.broadcast %46 : vector<2x16x1xf32> to vector<2x16x256xf32>
    %48 = arith.mulf %1, %47 : vector<2x16x256xf32>
    %c0_31 = arith.constant 0 : index
    %c0_32 = arith.constant 0 : index
    %49 = vector.load %arg6[%c0_31, %c0_32] : memref<256x256xbf16, #tpu.memory_space<vmem>>, vector<256x256xbf16>
    %c0_33 = arith.constant 0 : index
    %c0_34 = arith.constant 0 : index
    %50 = vector.load %arg7[%c0_33, %c0_34] : memref<256x256xbf16, #tpu.memory_space<vmem>>, vector<256x256xbf16>
    %cst_35 = arith.constant dense<0.000000e+00> : vector<2x256xf32>
    %51 = vector.multi_reduction <add>, %45, %cst_35 [1] : vector<2x16x256xf32> to vector<2x256xf32>
    %cst_36 = arith.constant 1.600000e+01 : f32
    %52 = vector.broadcast %cst_36 : f32 to vector<2x256xf32>
    %53 = arith.divf %51, %52 : vector<2x256xf32>
    %54 = arith.truncf %53 : vector<2x256xf32> to vector<2x256xbf16>
    %cst_37 = arith.constant dense<0xFF800000> : vector<2x256xf32>
    %55 = vector.multi_reduction <maximumf>, %45, %cst_37 [1] : vector<2x16x256xf32> to vector<2x256xf32>
    %56 = arith.truncf %55 : vector<2x256xf32> to vector<2x256xbf16>
    %cst_38 = arith.constant dense<0.000000e+00> : vector<2x256xf32>
    %57 = tpu.matmul %54, %49, %cst_38 {dimension_numbers = #tpu.dot_dimension_numbers<[1], [0], [0], [1], [0, 0, 1, 1], [], []>} : vector<2x256xbf16>, vector<256x256xbf16>, vector<2x256xf32> -> vector<2x256xf32>
    %cst_39 = arith.constant dense<0.000000e+00> : vector<2x256xf32>
    %58 = tpu.matmul %56, %50, %cst_39 {dimension_numbers = #tpu.dot_dimension_numbers<[1], [0], [0], [1], [0, 0, 1, 1], [], []>} : vector<2x256xbf16>, vector<256x256xbf16>, vector<2x256xf32> -> vector<2x256xf32>
    %59 = arith.addf %57, %58 : vector<2x256xf32>
    %cst_40 = arith.constant 0.000000e+00 : f32
    %60 = vector.broadcast %cst_40 : f32 to vector<2x256xf32>
    %61 = arith.subf %60, %59 : vector<2x256xf32>
    %62 = math.exp %61 : vector<2x256xf32>
    %cst_41 = arith.constant 1.000000e+00 : f32
    %63 = vector.broadcast %cst_41 : f32 to vector<2x256xf32>
    %64 = arith.addf %63, %62 : vector<2x256xf32>
    %65 = tpu.reciprocal %64 {approx = true} : vector<2x256xf32> -> vector<2x256xf32>
    %cst_42 = arith.constant 1.000000e+00 : f32
    %66 = vector.broadcast %cst_42 : f32 to vector<2x256xf32>
    %67 = arith.subf %65, %66 : vector<2x256xf32>
    %cst_43 = arith.constant 6.250000e-02 : f32
    %68 = vector.broadcast %cst_43 : f32 to vector<2x256xf32>
    %69 = arith.mulf %68, %67 : vector<2x256xf32>
    %cst_44 = arith.constant 1.000000e+00 : f32
    %70 = vector.broadcast %cst_44 : f32 to vector<2x256xf32>
    %71 = arith.addf %70, %69 : vector<2x256xf32>
    %72 = vector.shape_cast %71 : vector<2x256xf32> to vector<2x1x256xf32>
    %73 = vector.broadcast %72 : vector<2x1x256xf32> to vector<2x16x256xf32>
    %74 = arith.mulf %45, %73 : vector<2x16x256xf32>
    %cst_45 = arith.constant dense<0.000000e+00> : vector<2x256xf32>
    %75 = vector.multi_reduction <add>, %48, %cst_45 [1] : vector<2x16x256xf32> to vector<2x256xf32>
    %cst_46 = arith.constant 1.600000e+01 : f32
    %76 = vector.broadcast %cst_46 : f32 to vector<2x256xf32>
    %77 = arith.divf %75, %76 : vector<2x256xf32>
    %78 = arith.truncf %77 : vector<2x256xf32> to vector<2x256xbf16>
    %cst_47 = arith.constant dense<0xFF800000> : vector<2x256xf32>
    %79 = vector.multi_reduction <maximumf>, %48, %cst_47 [1] : vector<2x16x256xf32> to vector<2x256xf32>
    %80 = arith.truncf %79 : vector<2x256xf32> to vector<2x256xbf16>
    %cst_48 = arith.constant dense<0.000000e+00> : vector<2x256xf32>
    %81 = tpu.matmul %78, %49, %cst_48 {dimension_numbers = #tpu.dot_dimension_numbers<[1], [0], [0], [1], [0, 0, 1, 1], [], []>} : vector<2x256xbf16>, vector<256x256xbf16>, vector<2x256xf32> -> vector<2x256xf32>
    %cst_49 = arith.constant dense<0.000000e+00> : vector<2x256xf32>
    %82 = tpu.matmul %80, %50, %cst_49 {dimension_numbers = #tpu.dot_dimension_numbers<[1], [0], [0], [1], [0, 0, 1, 1], [], []>} : vector<2x256xbf16>, vector<256x256xbf16>, vector<2x256xf32> -> vector<2x256xf32>
    %83 = arith.addf %81, %82 : vector<2x256xf32>
    %cst_50 = arith.constant 0.000000e+00 : f32
    %84 = vector.broadcast %cst_50 : f32 to vector<2x256xf32>
    %85 = arith.subf %84, %83 : vector<2x256xf32>
    %86 = math.exp %85 : vector<2x256xf32>
    %cst_51 = arith.constant 1.000000e+00 : f32
    %87 = vector.broadcast %cst_51 : f32 to vector<2x256xf32>
    %88 = arith.addf %87, %86 : vector<2x256xf32>
    %89 = tpu.reciprocal %88 {approx = true} : vector<2x256xf32> -> vector<2x256xf32>
    %cst_52 = arith.constant 1.000000e+00 : f32
    %90 = vector.broadcast %cst_52 : f32 to vector<2x256xf32>
    %91 = arith.subf %89, %90 : vector<2x256xf32>
    %cst_53 = arith.constant 6.250000e-02 : f32
    %92 = vector.broadcast %cst_53 : f32 to vector<2x256xf32>
    %93 = arith.mulf %92, %91 : vector<2x256xf32>
    %cst_54 = arith.constant 1.000000e+00 : f32
    %94 = vector.broadcast %cst_54 : f32 to vector<2x256xf32>
    %95 = arith.addf %94, %93 : vector<2x256xf32>
    %96 = vector.shape_cast %95 : vector<2x256xf32> to vector<2x1x256xf32>
    %97 = vector.broadcast %96 : vector<2x1x256xf32> to vector<2x16x256xf32>
    %98 = arith.mulf %48, %97 : vector<2x16x256xf32>
    %99 = arith.addf %74, %98 : vector<2x16x256xf32>
    %cst_55 = arith.constant 5.000000e-01 : f32
    %100 = vector.broadcast %cst_55 : f32 to vector<2x16x256xf32>
    %101 = arith.mulf %100, %99 : vector<2x16x256xf32>
    %c0_56 = arith.constant 0 : index
    %c0_57 = arith.constant 0 : index
    %c0_58 = arith.constant 0 : index
    %102 = vector.load %arg8[%c0_56, %c0_57, %c0_58] : memref<2x16x256xf32, #tpu.memory_space<vmem>>, vector<2x16x256xf32>
    tpu.vector_store %arg8[%c0_56, %c0_57, %c0_58], %101 {strides = array<i32>} : memref<2x16x256xf32, #tpu.memory_space<vmem>>, vector<2x16x256xf32>,
    return
  }
  func.func @transform_0(%arg0: i32) -> (i32, i32, i32) {
    %c0_i32 = arith.constant 0 : i32
    %c0_i32_0 = arith.constant 0 : i32
    %c0_i32_1 = arith.constant 0 : i32
    %c0_i32_2 = arith.constant 0 : i32
    return %c0_i32, %c0_i32_0, %c0_i32_1 : i32, i32, i32
  }
  func.func @transform_1(%arg0: i32) -> (i32, i32, i32) {
    %c0_i32 = arith.constant 0 : i32
    %c0_i32_0 = arith.constant 0 : i32
    %c0_i32_1 = arith.constant 0 : i32
    %c0_i32_2 = arith.constant 0 : i32
    return %c0_i32, %c0_i32_0, %c0_i32_1 : i32, i32, i32
  }
  func.func @transform_2(%arg0: i32) -> (i32, i32) {
    %c0_i32 = arith.constant 0 : i32
    %c0_i32_0 = arith.constant 0 : i32
    %c0_i32_1 = arith.constant 0 : i32
    return %c0_i32, %c0_i32_0 : i32, i32
  }
  func.func @transform_3(%arg0: i32) -> (i32, i32) {
    %c0_i32 = arith.constant 0 : i32
    %c0_i32_0 = arith.constant 0 : i32
    %c0_i32_1 = arith.constant 0 : i32
    return %c0_i32, %c0_i32_0 : i32, i32
  }
  func.func @transform_4(%arg0: i32) -> (i32, i32) {
    %c0_i32 = arith.constant 0 : i32
    %c0_i32_0 = arith.constant 0 : i32
    %c0_i32_1 = arith.constant 0 : i32
    return %c0_i32, %c0_i32_0 : i32, i32
  }
  func.func @transform_5(%arg0: i32) -> (i32, i32) {
    %c0_i32 = arith.constant 0 : i32
    %c0_i32_0 = arith.constant 0 : i32
    %c0_i32_1 = arith.constant 0 : i32
    return %c0_i32, %c0_i32_0 : i32, i32
  }
  func.func @transform_6(%arg0: i32) -> (i32, i32) {
    %c0_i32 = arith.constant 0 : i32
    %c0_i32_0 = arith.constant 0 : i32
    %c0_i32_1 = arith.constant 0 : i32
    return %c0_i32, %c0_i32_0 : i32, i32
  }
  func.func @transform_7(%arg0: i32) -> (i32, i32, i32) {
    %c0_i32 = arith.constant 0 : i32
    %c0_i32_0 = arith.constant 0 : i32
    %c0_i32_1 = arith.constant 0 : i32
    %c0_i32_2 = arith.constant 0 : i32
    return %c0_i32, %c0_i32_0, %c0_i32_1 : i32, i32, i32
  }
}

</mosaic_0001>

<bundles_post_ra>
// kernel: rotation_wrapper_forward.1
= control target key start
LH: loop header
LB: loop body
LE: loop exit
PB: predicated region body
PF: predicated region fallthrough
CT: control target
= control target key end

     0   :  { %v1641_v16 = vmov 0.0   ;;  %vm1642_vm0 = vmmov 0   ;;  %v77_v19 = vlaneseq  ;;  %vm88_vm1 = vcmask 130112   ;;  %s2393_s0 = inlined_call_operand.vmem [shape: f32[2,16,256], index: 0, kind: input, shape index: {}]   ;;  %s2394_s2 = inlined_call_operand.vmem [shape: f32[16,2], index: 2, kind: input, shape index: {}]   ;;  %s2395_s3 = inlined_call_operand.vmem [shape: f32[2,16], index: 3, kind: input, shape index: {}]   ;;  %s2396_s4 = inlined_call_operand.vmem [shape: f32[2,16], index: 4, kind: input, shape index: {}]   ;;  %s2397_s6 = inlined_call_operand.vmem [shape: bf16[256,256], index: 6, kind: input, shape index: {}]   ;;  %s2398_s5 = inlined_call_operand.vmem [shape: bf16[256,256], index: 5, kind: input, shape index: {}]   ;;  %s2399_s1 = inlined_call_operand.vmem [shape: f32[2,16,256], index: 1, kind: input, shape index: {}]   ;;  %s2400_s7 = inlined_call_operand.vmem [shape: f32[2,16,256], index: 7, kind: output, shape index: {}]  }
   0x1   :  { %v1687_v0 = vld [vmem:[%s2393_s0 + $0x20] sm:$0xff]  ;;  %v1692_v1 = vld [vmem:[%s2393_s0 + $0x28] sm:$0xff]  ;;  %v1709_v5 = vld [vmem:[%s2393_s0 + $0x30] sm:$0xff]  ;;  %1494 = vmatprep.subr.mxu0 %v1641_v16  ;;  %1501 = vmatprep.subr.mxu1 %v1641_v16  ;;  %vm99_vm2 = vcmask 1041409   ;;  %vm101_vm3 = vcmask 130048   ;;  %vm277_vm4 = vcmask 1041408  }
   0x2   :  { %v1697_v2 = vld [vmem:[%s2393_s0] sm:$0xff]  ;;  %v48_v3 = vadd.f32 %v1692_v1, %v1687_v0  ;;  %v1704_v4 = vld [vmem:[%s2393_s0 + $0x8] sm:$0xff]  ;;  %v1714_v6 = vld [vmem:[%s2393_s0 + $0x38] sm:$0xff]  ;;  %v65_v15 = vmax.f32 %v1687_v0, %v1692_v1  ;;  %1498 = vmatprep.mubr.msk.f32.mxu0 %vm1642_vm0, %v1641_v16  ;;  %1505 = vmatprep.mubr.msk.f32.mxu1 %vm1642_vm0, %v1641_v16  ;;  %v78_v20 = vand.u32 127, %v77_v19  ;;  %v1748_v21 = vshrl.u32 %v77_v19, 7 }
   0x3   :  { %v42_v7 = vadd.f32 %v1704_v4, %v1697_v2  ;;  %v1721_v8 = vld [vmem:[%s2393_s0 + $0x10] sm:$0xff]  ;;  %v1726_v9 = vld [vmem:[%s2393_s0 + $0x18] sm:$0xff]  ;;  %v51_v10 = vadd.f32 %v1714_v6, %v1709_v5  ;;  %v59_v13 = vmax.f32 %v1697_v2, %v1704_v4  ;;  %v68_v14 = vmax.f32 %v1709_v5, %v1714_v6  ;;  %v72_v17 = vld [vmem:[%s2394_s2 + $0x8] sm:$0xff] }
   0x4   :  { %49 = vadd.xlane.f32.xlu1 %v48_v3  ;;  %v45_v11 = vadd.f32 %v1726_v9, %v1721_v8  ;;  %v62_v12 = vmax.f32 %v1721_v8, %v1726_v9  ;;  %1495 = vmatpush3.msra.mxu0 %v72_v17  ;;  %v71_v18 = vld [vmem:[%s2394_s2] sm:$0xff]  ;;  %2459 = vst [vmem:[#allocation2_spill] sm:$0xff] %v1748_v21  ;;  %v83_v22 = vadd.s32 4294967288, %v78_v20  ;;  %vm273_vm5 = vcmask 15360   ;;  %v1769_v60 = vld [vmem:[%s2397_s6 + $0x70] ss:$8 sps:$4 sm:$0xff]  }
   0x5   :  { %43 = vadd.xlane.f32.xlu0 %v42_v7  ;;  %1502 = vmatpush3.msra.mxu1 %v72_v17  ;;  %v81_v25 = vsub.s32 %v78_v20, %v1748_v21  ;;  %v272_v51 = vld [vmem:[%s2395_s3] sm:$0x3]  ;;  %v1774_v61 = vld [vmem:[%s2397_s6 + $0x74] ss:$8 sps:$4 sm:$0xff]   ;;  %v1779_v62 = vld [vmem:[%s2398_s5 + $0x70] ss:$8 sps:$4 sm:$0xff]  }
   0x6   :  { %1496 = vmatprep.subr.mxu0 %v1641_v16  ;;  %1503 = vmatprep.subr.mxu1 %v1641_v16  ;;  %v86_v27 = vsub.s32 %v83_v22, %v1748_v21  ;;  %v351_v52 = vld [vmem:[%s2396_s4] sm:$0x3]  ;;  %v1784_v63 = vld [vmem:[%s2398_s5 + $0x74] ss:$8 sps:$4 sm:$0xff]   ;;  %v1795_v7 = vld [vmem:[%s2397_s6 + $0x64] ss:$8 sps:$4 sm:$0xff]  }
   0x7   :  { %1497 = vmatpush3.msra.mxu0 %v71_v18  ;;  %1504 = vmatpush3.msra.mxu1 %v71_v18  ;;  %v1790_v3 = vld [vmem:[%s2397_s6 + $0x60] ss:$8 sps:$4 sm:$0xff]   ;;  %v1844_v17 = vld [vmem:[%s2398_s5 + $0x44] ss:$8 sps:$4 sm:$0xff]   ;;  %v1862_v20 = vld [vmem:[%s2397_s6 + $0x34] ss:$8 sps:$4 sm:$0xff]  }
   0x8   :  { %52 = vadd.xlane.f32.xlu1 %v51_v10  ;;  %1508 = vmatprep.subr.mxu0 %v1641_v16  ;;  %v1802_v10 = vld [vmem:[%s2398_s5 + $0x60] ss:$8 sps:$4 sm:$0xff]   ;;  %v1868_v22 = vld [vmem:[%s2398_s5 + $0x34] ss:$8 sps:$4 sm:$0xff]  }
   0x9   :  { %46 = vadd.xlane.f32.xlu0 %v45_v11  ;;  %1513 = vmatprep.subr.mxu1 %v1641_v16  ;;  %v1809_v11 = vld [vmem:[%s2398_s5 + $0x64] ss:$8 sps:$4 sm:$0xff]   ;;  %v1849_v18 = vld [vmem:[%s2397_s6 + $0x40] ss:$8 sps:$4 sm:$0xff]  }
   0xa   :  { %v1855_v19 = vld [vmem:[%s2398_s5 + $0x40] ss:$8 sps:$4 sm:$0xff]  }
   0xc   :  { %63 = vmax.xlane.f32.xlu1 %v62_v12  ;;  %v1814_v12 = vld [vmem:[%s2397_s6 + $0x54] ss:$8 sps:$4 sm:$0xff]  }
   0xd   :  { %60 = vmax.xlane.f32.xlu0 %v59_v13  ;;  %v1820_v13 = vld [vmem:[%s2397_s6 + $0x50] ss:$8 sps:$4 sm:$0xff]  }
  0x10   :  { %69 = vmax.xlane.f32.xlu1 %v68_v14  ;;  %v1825_v14 = vld [vmem:[%s2398_s5 + $0x54] ss:$8 sps:$4 sm:$0xff]  }
  0x11   :  { %66 = vmax.xlane.f32.xlu0 %v65_v15  ;;  %v1831_v15 = vld [vmem:[%s2398_s5 + $0x50] ss:$8 sps:$4 sm:$0xff]  }
  0x8d   :  { %v50_v23 = vpop.xlane.xlu1 %49 }
  0x8e   :  { %v44_v24 = vpop.xlane.xlu0 %43  ;;  %v57_v26 = vmul.f32 0.00390625, %v50_v23  ;;  %v1873_v23 = vld [vmem:[%s2397_s6 + $0x30] ss:$8 sps:$4 sm:$0xff]  }
  0x8f   :  { %v55_v28 = vmul.f32 0.00390625, %v44_v24  ;;  %v1879_v24 = vld [vmem:[%s2398_s5 + $0x30] ss:$8 sps:$4 sm:$0xff]  }
  0x90   :  { %v93_v33 = vrot.slane %v57_v26, %v81_v25  ;;  %v1892_v26 = vld [vmem:[%s2398_s5 + $0x24] ss:$8 sps:$4 sm:$0xff]  }
  0x91   :  { %v53_v29 = vpop.xlane.xlu1 %52  ;;  %v82_v35 = vrot.slane %v55_v28, %v81_v25  ;;  %2460 = vst [vmem:[#allocation3_spill] sm:$0xff] %v1892_v26  ;;  %v1903_v28 = vld [vmem:[%s2398_s5 + $0x20] ss:$8 sps:$4 sm:$0xff]  }
  0x92   :  { %v58_v30 = vmul.f32 0.00390625, %v53_v29  ;;  %v47_v31 = vpop.xlane.xlu0 %46  ;;  %2461 = vst [vmem:[#allocation4_spill] sm:$0xff] %v1903_v28  ;;  %v1910_v29 = vld [vmem:[%s2397_s6 + $0x14] ss:$8 sps:$4 sm:$0xff]  }
  0x93   :  { %v56_v32 = vmul.f32 0.00390625, %v47_v31  ;;  %v1921_v31 = vld [vmem:[%s2398_s5 + $0x14] ss:$8 sps:$4 sm:$0xff]  }
  0x94   :  { %v97_v34 = vrot.slane %v58_v30, %v86_v27  ;;  %v1916_v30 = vld [vmem:[%s2397_s6 + $0x10] ss:$8 sps:$4 sm:$0xff]   ;;  %2463 = vst [vmem:[#allocation6_spill] sm:$0xff] %v1921_v31 }
  0x95   :  { %v87_v36 = vrot.slane %v56_v32, %v86_v27  ;;  %v64_v37 = vpop.xlane.xlu1 %63  ;;  %2462 = vst [vmem:[#allocation5_spill] sm:$0xff] %v1916_v30  ;;  %v1926_v32 = vld [vmem:[%s2398_s5 + $0x10] ss:$8 sps:$4 sm:$0xff]  }
  0x96   :  { %v61_v38 = vpop.xlane.xlu0 %60  ;;  %v98_v39 = vsel %vm88_vm1, %v97_v34, %v93_v33  ;;  %v186_v42 = vrot.slane %v64_v37, %v86_v27  ;;  %2464 = vst [vmem:[#allocation7_spill] sm:$0xff] %v1926_v32  ;;  %v1931_v33 = vld [vmem:[%s2397_s6 + $0x4] ss:$8 sps:$4 sm:$0xff]   ;;  %v1955_v37 = vld [vmem:[%s2397_s6 + $0xf4] ss:$8 sps:$4 sm:$0xff]  }
  0x97   :  { %v89_v40 = vsel %vm88_vm1, %v87_v36, %v82_v35  ;;  %v182_v43 = vrot.slane %v61_v38, %v81_v25  ;;  %2465 = vst [vmem:[#allocation8_spill] sm:$0xff] %v1931_v33  ;;  %v1937_v34 = vld [vmem:[%s2398_s5 + $0x4] ss:$8 sps:$4 sm:$0xff]   ;;  %v1945_v35 = vld [vmem:[%s2397_s6] ss:$8 sps:$4 sm:$0xff]   ;;  %2469 = vst [vmem:[#allocation12_spill] sm:$0xff] %v1955_v37 }
  0x98   :  { %v100_v41 = vsel %vm99_vm2, %v98_v39, %v89_v40  ;;  %2466 = vst [vmem:[#allocation9_spill] sm:$0xff] %v1937_v34  ;;  %2467 = vst [vmem:[#allocation10_spill] sm:$0xff] %v1945_v35  ;;  %v1950_v36 = vld [vmem:[%s2398_s5] ss:$8 sps:$4 sm:$0xff]   ;;  %v1965_v38 = vld [vmem:[%s2397_s6 + $0xf0] ss:$8 sps:$4 sm:$0xff]  }
  0x99   :  { %1499 = vmatmul.mubr.msk.f32.vlgmr.msra.gmra.mxu0 %vm101_vm3, %v100_v41  ;;  %v70_v44 = vpop.xlane.xlu1 %69  ;;  %v187_v48 = vsel %vm88_vm1, %v186_v42, %v182_v43  ;;  %2468 = vst [vmem:[#allocation11_spill] sm:$0xff] %v1950_v36  ;;  %2470 = vst [vmem:[#allocation13_spill] sm:$0xff] %v1965_v38 }
  0x9a   :  { %v195_v45 = vrot.slane %v70_v44, %v86_v27  ;;  %v67_v46 = vpop.xlane.xlu0 %66  ;;  %1510 = vmatprep.mubr.msk.f32.mxu0 %vm1642_vm0, %v1641_v16  ;;  %1509 = vmatpush3.msk.msra.mxu0 %vm277_vm4, %v272_v51  ;;  %v1897_v27 = vld [vmem:[%s2397_s6 + $0x20] ss:$8 sps:$4 sm:$0xff]   ;;  %v1973_v51 = vld [vmem:[%s2398_s5 + $0xf4] ss:$8 sps:$4 sm:$0xff]  }
  0x9b   :  { %v191_v47 = vrot.slane %v67_v46, %v81_v25  ;;  %808 = vmatprep.subr.bf16.mxu0 %v1774_v61  ;;  %v1886_v25 = vld [vmem:[%s2397_s6 + $0x24] ss:$8 sps:$4 sm:$0xff]   ;;  %2471 = vst [vmem:[#allocation14_spill] sm:$0xff] %v1973_v51 }
  0x9d   :  { %v196_v49 = vsel %vm88_vm1, %v195_v45, %v191_v47 }
  0x9e   :  { %v197_v50 = vsel %vm99_vm2, %v196_v49, %v187_v48 }
  0x9f   :  { %1506 = vmatmul.mubr.msk.f32.vlgmr.msra.gmra.mxu1 %vm101_vm3, %v197_v50 }
  0xa0   :  { %1515 = vmatprep.mubr.msk.f32.mxu1 %vm1642_vm0, %v1641_v16  ;;  %1514 = vmatpush3.msk.msra.mxu1 %vm277_vm4, %v351_v52  ;;  %v1838_v16 = vld [vmem:[%s2397_s6 + $0x44] ss:$8 sps:$4 sm:$0xff]   ;;  %v1978_v52 = vld [vmem:[%s2398_s5 + $0xf0] ss:$8 sps:$4 sm:$0xff]  }
  0xa1   :  { %1023 = vmatprep.subr.bf16.mxu1 %v1784_v63  ;;  %2472 = vst [vmem:[#allocation15_spill] sm:$0xff] %v1978_v52 }
 0x159   :  { %v170_v53 = vpop.f32.mrf.mxu0 }
 0x15a   :  { %v174_v56 = vmax.f32 %v170_v53, 0.0  ;;  %v1984_v53 = vld [vmem:[%s2397_s6 + $0xe4] ss:$8 sps:$4 sm:$0xff]  }
 0x15b   :  { %v1500_v54 = vpop.f32.mrf.mxu0  ;;  %2473 = vst [vmem:[#allocation16_spill] sm:$0xff] %v1984_v53 }
 0x15c   :  { %v1990_v54 = vld [vmem:[%s2397_s6 + $0xe0] ss:$8 sps:$4 sm:$0xff]  }
 0x15d   :  { %2474 = vst [vmem:[#allocation17_spill] sm:$0xff] %v1990_v54 }
 0x15f   :  { %v266_v55 = vpop.f32.mrf.mxu1 }
 0x160   :  { %v270_v57 = vmax.f32 %v266_v55, 0.0 }
 0x161   :  { %v1507_v58 = vpop.f32.mrf.mxu1 }
 0x162   :  { %v271_v59 = vadd.f32 %v270_v57, %v174_v56  ;;  %v1996_v56 = vld [vmem:[%s2398_s5 + $0xe4] ss:$8 sps:$4 sm:$0xff]  }
 0x163   :  { %2475 = vst [vmem:[#allocation18_spill] sm:$0xff] %v1996_v56 }
 0x164   :  { %1511 = vmatmul.mubr.msk.f32.vlgmr.msra.gmra.mxu0 %vm273_vm5, %v271_v59  ;;  %1516 = vmatmul.mubr.msk.f32.vlgmr.msra.gmra.mxu1 %vm273_vm5, %v271_v59  ;;  %v2002_v59 = vld [vmem:[%s2398_s5 + $0xe0] ss:$8 sps:$4 sm:$0xff]  }
 0x165   :  { %809 = vmatpush1.bf16.msra.mxu0 %v1769_v60  ;;  %1024 = vmatpush1.bf16.msra.mxu1 %v1779_v62  ;;  %2476 = vst [vmem:[#allocation19_spill] sm:$0xff] %v2002_v59 }
 0x166   :  { %810 = vmatprep.subr.bf16.mxu0 %v1795_v7  ;;  %1025 = vmatprep.subr.bf16.mxu1 %v1809_v11 }
 0x169   :  { %811 = vmatpush1.bf16.msra.mxu0 %v1790_v3  ;;  %1026 = vmatpush1.bf16.msra.mxu1 %v1802_v10 }
 0x16a   :  { %812 = vmatprep.subr.bf16.mxu0 %v1814_v12  ;;  %1027 = vmatprep.subr.bf16.mxu1 %v1825_v14 }
 0x16d   :  { %813 = vmatpush1.bf16.msra.mxu0 %v1820_v13  ;;  %1028 = vmatpush1.bf16.msra.mxu1 %v1831_v15 }
 0x16e   :  { %814 = vmatprep.subr.bf16.mxu0 %v1838_v16  ;;  %1029 = vmatprep.subr.bf16.mxu1 %v1844_v17 }
 0x171   :  { %815 = vmatpush1.bf16.msra.mxu0 %v1849_v18  ;;  %1030 = vmatpush1.bf16.msra.mxu1 %v1855_v19 }
 0x172   :  { %816 = vmatprep.subr.bf16.mxu0 %v1862_v20  ;;  %1031 = vmatprep.subr.bf16.mxu1 %v1868_v22 }
 0x175   :  { %817 = vmatpush1.bf16.msra.mxu0 %v1873_v23  ;;  %1032 = vmatpush1.bf16.msra.mxu1 %v1879_v24 }
 0x176   :  { %818 = vmatprep.subr.bf16.mxu0 %v1886_v25  ;;  %1033 = vmatprep.subr.bf16.mxu1 %v1892_v26 }
 0x179   :  { %819 = vmatpush1.bf16.msra.mxu0 %v1897_v27  ;;  %1034 = vmatpush1.bf16.msra.mxu1 %v1903_v28 }
 0x17a   :  { %820 = vmatprep.subr.bf16.mxu0 %v1910_v29  ;;  %1035 = vmatprep.subr.bf16.mxu1 %v1921_v31 }
 0x17d   :  { %821 = vmatpush1.bf16.msra.mxu0 %v1916_v30  ;;  %1036 = vmatpush1.bf16.msra.mxu1 %v1926_v32 }
 0x17e   :  { %822 = vmatprep.subr.bf16.mxu0 %v1931_v33  ;;  %1037 = vmatprep.subr.bf16.mxu1 %v1937_v34 }
 0x181   :  { %823 = vmatpush1.bf16.msra.mxu0 %v1945_v35  ;;  %1038 = vmatpush1.bf16.msra.mxu1 %v1950_v36 }
 0x182   :  { %824 = vmatprep.subr.bf16.mxu0 %v1955_v37  ;;  %1039 = vmatprep.subr.bf16.mxu1 %v1973_v51 }
 0x185   :  { %825 = vmatpush2.bf16.msra.mxu0 %v1965_v38  ;;  %1040 = vmatpush2.bf16.msra.mxu1 %v1978_v52 }
 0x186   :  { %826 = vmatprep.subr.bf16.mxu0 %v1984_v53  ;;  %1041 = vmatprep.subr.bf16.mxu1 %v1996_v56 }
 0x189   :  { %827 = vmatpush2.bf16.msra.mxu0 %v1990_v54  ;;  %1042 = vmatpush2.bf16.msra.mxu1 %v2002_v59 }
 0x224   :  { %v347_v39 = vpop.f32.mrf.mxu0  ;;  %v421_v40 = vpop.f32.mrf.mxu1 }
 0x225   :  { %v425_v41 = vsub.f32 0.0, %v347_v39  ;;  %v433_v42 = vsub.f32 0.0, %v421_v40  ;;  %v2008_v40 = vld [vmem:[%s2397_s6 + $0xd4] ss:$8 sps:$4 sm:$0xff]  }
 0x226   :  { %v1512_v43 = vpop.f32.mrf.mxu0  ;;  %v1517_v44 = vpop.f32.mrf.mxu1  ;;  %2477 = vst [vmem:[#allocation20_spill] sm:$0xff] %v2008_v40  ;;  %828 = vmatprep.subr.bf16.mxu0 %v2008_v40 }
 0x227   :  { %v426_v45 = vmul.f32 1.442695, %v425_v41  ;;  %v434_v46 = vmul.f32 1.442695, %v433_v42  ;;  %v2011_v42 = vsub.s32 0, %v1748_v21 }
 0x228   :  { %v2017_v43 = vld [vmem:[%s2397_s6 + $0xd0] ss:$8 sps:$4 sm:$0xff]  }
 0x229   :  { %1617 = vpow2.f32 %v426_v45  ;;  %2478 = vst [vmem:[#allocation21_spill] sm:$0xff] %v2011_v42  ;;  %2479 = vst [vmem:[#allocation22_spill] sm:$0xff] %v2017_v43  ;;  %v2023_v45 = vld [vmem:[%s2398_s5 + $0xd4] ss:$8 sps:$4 sm:$0xff]   ;;  %829 = vmatpush2.bf16.msra.mxu0 %v2017_v43 }
 0x22a   :  { %1619 = vpow2.f32 %v434_v46  ;;  %2480 = vst [vmem:[#allocation23_spill] sm:$0xff] %v2023_v45  ;;  %1043 = vmatprep.subr.bf16.mxu1 %v2023_v45 }
 0x236   :  { %v1618_v47 = vpop.eup %1617 }
 0x237   :  { %v1620_v48 = vpop.eup %1619  ;;  %v428_v49 = vadd.f32 1.0, %v1618_v47  ;;  %v2029_v47 = vld [vmem:[%s2398_s5 + $0xd0] ss:$8 sps:$4 sm:$0xff]  }
 0x238   :  { %v436_v50 = vadd.f32 1.0, %v1620_v48  ;;  %2481 = vst [vmem:[#allocation24_spill] sm:$0xff] %v2029_v47  ;;  %v2035_v48 = vld [vmem:[%s2397_s6 + $0xc4] ss:$8 sps:$4 sm:$0xff]   ;;  %1044 = vmatpush2.bf16.msra.mxu1 %v2029_v47 }
 0x239   :  { %1621 = vrcp.f32 %v428_v49  ;;  %2482 = vst [vmem:[#allocation25_spill] sm:$0xff] %v2035_v48  ;;  %830 = vmatprep.subr.bf16.mxu0 %v2035_v48 }
 0x23a   :  { %1623 = vrcp.f32 %v436_v50  ;;  %v2039_v50 = vsub.s32 1, %v1748_v21  ;;  %v2079_v21 = vld [vmem:[%s2398_s5 + $0xb4] ss:$8 sps:$4 sm:$0xff]  }
 0x23b   :  { %2489 = vst [vmem:[#allocation32_spill] sm:$0xff] %v2079_v21 }
 0x23c   :  { %2483 = vst [vmem:[#allocation26_spill] sm:$0xff] %v2039_v50 }
 0x246   :  { %v1622_v55 = vpop.eup %1621 }
 0x247   :  { %v1624_v57 = vpop.eup %1623  ;;  %v1414_v58 = vadd.f32 -1.0, %v1622_v55 }
 0x248   :  { %v1415_v39 = vadd.f32 -1.0, %v1624_v57  ;;  %v2045_v57 = vld [vmem:[%s2397_s6 + $0xc0] ss:$8 sps:$4 sm:$0xff]  }
 0x249   :  { %v431_v41 = vmul.f32 0.042, %v1414_v58  ;;  %2484 = vst [vmem:[#allocation27_spill] sm:$0xff] %v2045_v57  ;;  %831 = vmatpush2.bf16.msra.mxu0 %v2045_v57 }
 0x24a   :  { %v439_v44 = vmul.f32 0.042, %v1415_v39 }
 0x24b   :  { %v432_v46 = vadd.f32 1.0, %v431_v41  ;;  %v2054_v41 = vld [vmem:[%s2398_s5 + $0xc4] ss:$8 sps:$4 sm:$0xff]  }
 0x24c   :  { %v440_v55 = vadd.f32 1.0, %v439_v44  ;;  %2485 = vst [vmem:[#allocation28_spill] sm:$0xff] %v2054_v41  ;;  %v2059_v44 = vld [vmem:[%s2398_s5 + $0xc0] ss:$8 sps:$4 sm:$0xff]   ;;  %1045 = vmatprep.subr.bf16.mxu1 %v2054_v41  ;;  %v2084_v41 = vld [vmem:[%s2398_s5 + $0xb0] ss:$8 sps:$4 sm:$0xff]  }
 0x24d   :  { %v444_v49 = vrot.slane %v432_v46, %v2011_v42  ;;  %v455_v58 = vrot.slane %v432_v46, %v2039_v50  ;;  %2486 = vst [vmem:[#allocation29_spill] sm:$0xff] %v2059_v44  ;;  %v2070_v46 = vld [vmem:[%s2397_s6 + $0xb0] ss:$8 sps:$4 sm:$0xff]   ;;  %1046 = vmatpush2.bf16.msra.mxu1 %v2059_v44  ;;  %2490 = vst [vmem:[#allocation33_spill] sm:$0xff] %v2084_v41 }
 0x24e   :  { %v474_v39 = vrot.slane %v440_v55, %v2011_v42  ;;  %2488 = vst [vmem:[#allocation31_spill] sm:$0xff] %v2070_v46  ;;  %v485_v42 = vrot.slane %v440_v55, %v2039_v50  ;;  %1047 = vmatprep.subr.bf16.mxu1 %v2079_v21  ;;  %v2090_v55 = vld [vmem:[%s2397_s6 + $0xa4] ss:$8 sps:$4 sm:$0xff]   ;;  %v2120_v21 = vld [vmem:[%s2397_s6 + $0x90] ss:$8 sps:$4 sm:$0xff]  }
 0x24f   :  { %450 = vbcast.lane.b32.xlu1 %v444_v49, 264  ;;  %446 = vbcast.lane.b32.xlu0 %v444_v49, 256  ;;  %v2064_v49 = vld [vmem:[%s2397_s6 + $0xb4] ss:$8 sps:$4 sm:$0xff]   ;;  %2491 = vst [vmem:[#allocation34_spill] sm:$0xff] %v2090_v55  ;;  %2496 = vst [vmem:[#allocation39_spill] sm:$0xff] %v2120_v21 }
 0x250   :  { %2487 = vst [vmem:[#allocation30_spill] sm:$0xff] %v2064_v49  ;;  %832 = vmatprep.subr.bf16.mxu0 %v2064_v49  ;;  %v2102_v50 = vld [vmem:[%s2398_s5 + $0xa4] ss:$8 sps:$4 sm:$0xff]  }
 0x251   :  { %833 = vmatpush2.bf16.msra.mxu0 %v2070_v46  ;;  %1048 = vmatpush2.bf16.msra.mxu1 %v2084_v41  ;;  %2493 = vst [vmem:[#allocation36_spill] sm:$0xff] %v2102_v50  ;;  %v2114_v41 = vld [vmem:[%s2397_s6 + $0x94] ss:$8 sps:$4 sm:$0xff]  }
 0x252   :  { %834 = vmatprep.subr.bf16.mxu0 %v2090_v55  ;;  %1049 = vmatprep.subr.bf16.mxu1 %v2102_v50  ;;  %2495 = vst [vmem:[#allocation38_spill] sm:$0xff] %v2114_v41  ;;  %v2144_v50 = vld [vmem:[%s2397_s6 + $0x80] ss:$8 sps:$4 sm:$0xff]  }
 0x253   :  { %457 = vbcast.lane.b32.xlu1 %v455_v58, 256  ;;  %476 = vbcast.lane.b32.xlu0 %v474_v39, 256  ;;  %2500 = vst [vmem:[#allocation43_spill] sm:$0xff] %v2144_v50 }
 0x257   :  { %461 = vbcast.lane.b32.xlu1 %v455_v58, 264  ;;  %487 = vbcast.lane.b32.xlu0 %v485_v42, 256  ;;  %v2096_v58 = vld [vmem:[%s2397_s6 + $0xa0] ss:$8 sps:$4 sm:$0xff]  }
 0x258   :  { %2492 = vst [vmem:[#allocation35_spill] sm:$0xff] %v2096_v58  ;;  %835 = vmatpush2.bf16.msra.mxu0 %v2096_v58  ;;  %v2126_v58 = vld [vmem:[%s2398_s5 + $0x94] ss:$8 sps:$4 sm:$0xff]  }
 0x259   :  { %836 = vmatprep.subr.bf16.mxu0 %v2114_v41  ;;  %2497 = vst [vmem:[#allocation40_spill] sm:$0xff] %v2126_v58 }
 0x25b   :  { %480 = vbcast.lane.b32.xlu1 %v474_v39, 264  ;;  %v2108_v39 = vld [vmem:[%s2398_s5 + $0xa0] ss:$8 sps:$4 sm:$0xff]  }
 0x25c   :  { %2494 = vst [vmem:[#allocation37_spill] sm:$0xff] %v2108_v39  ;;  %1050 = vmatpush2.bf16.msra.mxu1 %v2108_v39  ;;  %837 = vmatpush2.bf16.msra.mxu0 %v2120_v21  ;;  %v2138_v39 = vld [vmem:[%s2397_s6 + $0x84] ss:$8 sps:$4 sm:$0xff]  }
 0x25d   :  { %1051 = vmatprep.subr.bf16.mxu1 %v2126_v58  ;;  %2499 = vst [vmem:[#allocation42_spill] sm:$0xff] %v2138_v39  ;;  %838 = vmatprep.subr.bf16.mxu0 %v2138_v39  ;;  %v2150_v21 = vld [vmem:[%s2398_s5 + $0x84] ss:$8 sps:$4 sm:$0xff]   ;;  %v2156_v58 = vld [vmem:[%s2398_s5 + $0x80] ss:$8 sps:$4 sm:$0xff]  }
 0x25e   :  { %2501 = vst [vmem:[#allocation44_spill] sm:$0xff] %v2150_v21  ;;  %2502 = vst [vmem:[#allocation45_spill] sm:$0xff] %v2156_v58 }
 0x25f   :  { %491 = vbcast.lane.b32.xlu1 %v485_v42, 264  ;;  %v2132_v42 = vld [vmem:[%s2398_s5 + $0x90] ss:$8 sps:$4 sm:$0xff]  }
 0x260   :  { %2498 = vst [vmem:[#allocation41_spill] sm:$0xff] %v2132_v42  ;;  %1052 = vmatpush2.bf16.msra.mxu1 %v2132_v42  ;;  %839 = vmatpush2.bf16.msra.mxu0 %v2144_v50 }
 0x261   :  { %1053 = vmatprep.subr.bf16.mxu1 %v2150_v21  ;;  %1215 = vmatprep.subr.bf16.mxu0 %v1774_v61 }
 0x264   :  { %1054 = vmatpush2.bf16.msra.mxu1 %v2156_v58 }
 0x265   :  { %1270 = vmatprep.subr.bf16.mxu1 %v1784_v63 }
 0x2c1   :  { %v451_v42 = vpop.permute.xlu1 %450  ;;  %v447_v39 = vpop.permute.xlu0 %446 }
 0x2c2   :  { %v2163_v41 = vmul.f32 %v451_v42, %v1721_v8  ;;  %v2166_v50 = vmul.f32 %v447_v39, %v1697_v2  ;;  %v2171_v55 = vmul.f32 %v451_v42, %v1726_v9  ;;  %v2174_v61 = vmul.f32 %v447_v39, %v1704_v4 }
 0x2c4   :  { %2503 = vst [vmem:[#allocation46_spill] sm:$0xff] %v2163_v41  ;;  %2504 = vst [vmem:[#allocation47_spill] sm:$0xff] %v2166_v50  ;;  %v602_v44 = vmax.f32 %v2166_v50, %v2163_v41  ;;  %v565_v63 = vadd.f32 %v2163_v41, %v2166_v50  ;;  %v609_v8 = vmax.f32 %v2174_v61, %v2171_v55 }
 0x2c5   :  { %2505 = vst [vmem:[#allocation48_spill] sm:$0xff] %v2171_v55  ;;  %2506 = vst [vmem:[#allocation49_spill] sm:$0xff] %v2174_v61  ;;  %v458_v58 = vpop.permute.xlu1 %457 }
 0x2c6   :  { %v603_v21 = vrot.slane %v602_v44, 4  ;;  %v566_v2 = vrot.slane %v565_v63, 4  ;;  %v2181_v47 = vmul.f32 %v458_v58, %v1687_v0  ;;  %v2184_v49 = vmul.f32 %v458_v58, %v1692_v1  ;;  %v37_v1 = vld [vmem:[%s2399_s1 + $0x18] sm:$0xff] }
 0x2c7   :  { %v610_v42 = vrot.slane %v609_v8, 4 }
 0x2c8   :  { %2507 = vst [vmem:[#allocation50_spill] sm:$0xff] %v2181_v47  ;;  %2508 = vst [vmem:[#allocation51_spill] sm:$0xff] %v2184_v49  ;;  %v604_v39 = vmax.f32 %v602_v44, %v603_v21  ;;  %v567_v58 = vadd.f32 %v566_v2, %v565_v63  ;;  %v35_v21 = vld [vmem:[%s2399_s1 + $0x8] sm:$0xff] }
 0x2c9   :  { %v462_v46 = vpop.permute.xlu1 %461  ;;  %v611_v63 = vmax.f32 %v609_v8, %v610_v42 }
 0x2ca   :  { %v2187_v9 = vmul.f32 %v462_v46, %v1709_v5  ;;  %v2190_v4 = vmul.f32 %v462_v46, %v1714_v6  ;;  %v2203_v6 = vpop.permute.xlu0 %476  ;;  %v568_v56 = vrot.slane %v567_v58, 2 }
 0x2cb   :  { %v2216_v43 = vmul.f32 %v2203_v6, %v35_v21 }
 0x2cc   :  { %2509 = vst [vmem:[#allocation52_spill] sm:$0xff] %v2187_v9  ;;  %2510 = vst [vmem:[#allocation53_spill] sm:$0xff] %v2190_v4  ;;  %v579_v41 = vadd.f32 %v2187_v9, %v2181_v47  ;;  %v616_v50 = vmax.f32 %v2181_v47, %v2187_v9  ;;  %v623_v0 = vmax.f32 %v2184_v49, %v2190_v4  ;;  %v605_v47 = vrot.slane %v604_v39, 2 }
 0x2cd   :  { %v2201_v5 = vpop.permute.xlu1 %480  ;;  %v572_v9 = vadd.f32 %v2171_v55, %v2174_v61  ;;  %v586_v57 = vadd.f32 %v2190_v4, %v2184_v49  ;;  %2512 = vst [vmem:[#allocation55_spill] sm:$0xff] %v2216_v43  ;;  %v39_v4 = vld [vmem:[%s2399_s1 + $0x28] sm:$0xff] }
 0x2ce   :  { %v580_v44 = vrot.slane %v579_v41, 4  ;;  %v617_v46 = vrot.slane %v616_v50, 4  ;;  %v624_v45 = vrot.slane %v623_v0, 4  ;;  %v2213_v59 = vmul.f32 %v2201_v5, %v37_v1  ;;  %v2221_v49 = vpop.permute.xlu0 %487 }
 0x2cf   :  { %v573_v54 = vrot.slane %v572_v9, 4  ;;  %v606_v36 = vmax.f32 %v604_v39, %v605_v47  ;;  %v587_v55 = vrot.slane %v586_v57, 4  ;;  %v569_v39 = vadd.f32 %v568_v56, %v567_v58 }
 0x2d0   :  { %2511 = vst [vmem:[#allocation54_spill] sm:$0xff] %v2213_v59  ;;  %v581_v2 = vadd.f32 %v580_v44, %v579_v41  ;;  %v618_v48 = vmax.f32 %v616_v50, %v617_v46  ;;  %v625_v52 = vmax.f32 %v623_v0, %v624_v45  ;;  %v1176_v41 = vmax.f32 %v2216_v43, %v2213_v59  ;;  %v41_v50 = vld [vmem:[%s2399_s1 + $0x38] sm:$0xff] }
 0x2d1   :  { %v2228_v8 = vpop.permute.xlu1 %491  ;;  %v612_v45 = vrot.slane %v611_v63, 2  ;;  %v1140_v47 = vadd.f32 %v2213_v59, %v2216_v43  ;;  %v2233_v21 = vmul.f32 %v2221_v49, %v39_v4  ;;  %v574_v61 = vadd.f32 %v573_v54, %v572_v9 }
 0x2d2   :  { %v582_v40 = vrot.slane %v581_v2, 2  ;;  %v619_v51 = vrot.slane %v618_v48, 2  ;;  %v626_v1 = vrot.slane %v625_v52, 2  ;;  %v1177_v44 = vrot.slane %v1176_v41, 4 }
 0x2d3   :  { %2513 = vst [vmem:[#allocation56_spill] sm:$0xff] %v2233_v21  ;;  %v2236_v46 = vmul.f32 %v2228_v8, %v41_v50  ;;  %v607_v53 = vrot.slane %v606_v36, 1  ;;  %v588_v34 = vadd.f32 %v587_v55, %v586_v57  ;;  %v613_v32 = vmax.f32 %v611_v63, %v612_v45 }
 0x2d4   :  { %v620_v42 = vmax.f32 %v618_v48, %v619_v51  ;;  %v583_v0 = vadd.f32 %v582_v40, %v581_v2  ;;  %v1141_v37 = vrot.slane %v1140_v47, 4  ;;  %v570_v48 = vrot.slane %v569_v39, 1 }
 0x2d5   :  { %2514 = vst [vmem:[#allocation57_spill] sm:$0xff] %v2236_v46  ;;  %v1154_v51 = vadd.f32 %v2236_v46, %v2233_v21  ;;  %v627_v40 = vmax.f32 %v625_v52, %v626_v1  ;;  %v1178_v58 = vmax.f32 %v1176_v41, %v1177_v44  ;;  %v1190_v4 = vmax.f32 %v2233_v21, %v2236_v46 }
 0x2d6   :  { %v621_v38 = vrot.slane %v620_v42, 1  ;;  %v584_v56 = vrot.slane %v583_v0, 1  ;;  %v575_v59 = vrot.slane %v574_v61, 2  ;;  %v608_v50 = vmax.f32 %v606_v36, %v607_v53 }
 0x2d7   :  { %v1155_v2 = vrot.slane %v1154_v51, 4  ;;  %v589_v43 = vrot.slane %v588_v34, 2  ;;  %v1142_v9 = vadd.f32 %v1141_v37, %v1140_v47  ;;  %v1191_v55 = vrot.slane %v1190_v4, 4 }
 0x2d8   :  { %v622_v54 = vmax.f32 %v620_v42, %v621_v38  ;;  %v614_v63 = vrot.slane %v613_v32, 1  ;;  %v571_v45 = vadd.f32 %v570_v48, %v569_v39  ;;  %v585_v31 = vadd.f32 %v584_v56, %v583_v0 }
 0x2d9   :  { %v1156_v57 = vadd.f32 %v1155_v2, %v1154_v51  ;;  %v628_v35 = vrot.slane %v627_v40, 1  ;;  %v1179_v28 = vrot.slane %v1178_v58, 2  ;;  %v1192_v26 = vmax.f32 %v1190_v4, %v1191_v55 }
 0x2da   :  { %v615_v52 = vmax.f32 %v613_v32, %v614_v63  ;;  %v576_v41 = vadd.f32 %v575_v59, %v574_v61  ;;  %v630_v44 = vpack.c.bf16 %v608_v50, %v608_v50  ;;  %v632_v30 = vpack.c.bf16 %v622_v54, %v622_v54 }
 0x2db   :  { %v1157_v33 = vrot.slane %v1156_v57, 2  ;;  %v629_v1 = vmax.f32 %v627_v40, %v628_v35  ;;  %v590_v46 = vadd.f32 %v589_v43, %v588_v34  ;;  %v1143_v21 = vrot.slane %v1142_v9, 2 }
 0x2dc   :  { %v1193_v36 = vrot.slane %v1192_v26, 2  ;;  %v631_v53 = vpack.c.bf16 %v615_v52, %v615_v52  ;;  %v594_v38 = vmul.f32 0.0625, %v571_v45  ;;  %v638_v42 = vunpack.c.l.b16 %v630_v44 }
 0x2dd   :  { %v633_v37 = vpack.c.bf16 %v629_v1, %v629_v1  ;;  %v640_v47 = vunpack.c.l.b16 %v632_v30  ;;  %v596_v51 = vmul.f32 0.0625, %v585_v31  ;;  %v1180_v39 = vmax.f32 %v1178_v58, %v1179_v28 }
 0x2de   :  { %v1158_v0 = vadd.f32 %v1157_v33, %v1156_v57  ;;  %v1194_v48 = vmax.f32 %v1192_v26, %v1193_v36  ;;  %v639_v56 = vunpack.c.l.b16 %v631_v53  ;;  %v577_v59 = vrot.slane %v576_v41, 1 }
 0x2df   :  { %v641_v2 = vunpack.c.l.b16 %v633_v37  ;;  %v642_v32 = vsel %vm99_vm2, %v640_v47, %v638_v42  ;;  %v1144_v35 = vadd.f32 %v1143_v21, %v1142_v9  ;;  %v591_v40 = vrot.slane %v590_v46, 1 }
 0x2e0   :  { %v1195_v61 = vrot.slane %v1194_v48, 1  ;;  %v644_v43 = vpack.c.b16 %v642_v32, %v642_v32  ;;  %v578_v4 = vadd.f32 %v577_v59, %v576_v41  ;;  %v598_v50 = vpack.c.bf16 %v594_v38, %v594_v38 }
 0x2e1   :  { %v643_v34 = vsel %vm99_vm2, %v641_v2, %v639_v56  ;;  %v1159_v54 = vrot.slane %v1158_v0, 1  ;;  %v592_v30 = vadd.f32 %v591_v40, %v590_v46  ;;  %v600_v31 = vpack.c.bf16 %v596_v51, %v596_v51 }
 0x2e2   :  { %v645_v55 = vpack.c.b16 %v643_v34, %v643_v34  ;;  %v595_v28 = vmul.f32 0.0625, %v578_v4  ;;  %v1181_v33 = vrot.slane %v1180_v39, 1  ;;  %v1196_v57 = vmax.f32 %v1194_v48, %v1195_v61  ;;  %v2523_v4 = vld [vmem:[#allocation13_spill] sm:$0xff] }
 0x2e3   :  { %v597_v26 = vmul.f32 0.0625, %v592_v30  ;;  %v855_v58 = vunpack.c.l.b16 %v600_v31  ;;  %v853_v21 = vunpack.c.l.b16 %v598_v50  ;;  %v1145_v45 = vrot.slane %v1144_v35, 1  ;;  %v2524_v50 = vld [vmem:[#allocation9_spill] sm:$0xff] }
 0x2e4   :  { %840 = vmatprep.mubr.bf16.mxu0 %v645_v55  ;;  %v599_v63 = vpack.c.bf16 %v595_v28, %v595_v28  ;;  %v1182_v9 = vmax.f32 %v1180_v39, %v1181_v33  ;;  %v1200_v41 = vpack.c.bf16 %v1196_v57, %v1196_v57  ;;  %v1160_v1 = vadd.f32 %v1159_v54, %v1158_v0  ;;  %v2525_v54 = vld [vmem:[#allocation16_spill] sm:$0xff]  ;;  %v2526_v33 = vld [vmem:[#allocation11_spill] sm:$0xff] }
 0x2e5   :  { %841 = vmatmul.mubr.bf16.vlgmr.msra.gmra.mxu0 %v644_v43  ;;  %v601_v52 = vpack.c.bf16 %v597_v26, %v597_v26  ;;  %v857_v44 = vsel %vm99_vm2, %v855_v58, %v853_v21  ;;  %v1146_v36 = vadd.f32 %v1145_v45, %v1144_v35  ;;  %v2522_v43 = vld [vmem:[#allocation7_spill] sm:$0xff]  ;;  %v2527_v26 = vld [vmem:[#allocation17_spill] sm:$0xff]  ;;  %v2528_v58 = vld [vmem:[#allocation14_spill] sm:$0xff] }
 0x2e6   :  { %1216 = vmatpush1.bf16.msra.mxu0 %v1769_v60  ;;  %v1198_v46 = vpack.c.bf16 %v1182_v9, %v1182_v9  ;;  %v854_v53 = vunpack.c.l.b16 %v599_v63  ;;  %v1208_v37 = vunpack.c.l.b16 %v1200_v41  ;;  %v1164_v42 = vmul.f32 0.0625, %v1160_v1  ;;  %v2529_v57 = vld [vmem:[#allocation20_spill] sm:$0xff]  ;;  %v2531_v41 = vld [vmem:[#allocation22_spill] sm:$0xff] }
 0x2e7   :  { %1217 = vmatprep.subr.bf16.mxu0 %v1795_v7  ;;  %v856_v38 = vunpack.c.l.b16 %v601_v52  ;;  %v1162_v51 = vmul.f32 0.0625, %v1146_v36  ;;  %v859_v48 = vpack.c.b16 %v857_v44, %v857_v44  ;;  %v2530_v52 = vld [vmem:[#allocation15_spill] sm:$0xff]  ;;  %v2532_v1 = vld [vmem:[#allocation18_spill] sm:$0xff]  ;;  %v2533_v44 = vld [vmem:[#allocation25_spill] sm:$0xff] }
 0x2e8   :  { %v1206_v47 = vunpack.c.l.b16 %v1198_v46  ;;  %v1168_v60 = vpack.c.bf16 %v1164_v42, %v1164_v42  ;;  %v2535_v42 = vld [vmem:[#allocation27_spill] sm:$0xff] }
 0x2e9   :  { %v858_v39 = vsel %vm99_vm2, %v856_v38, %v854_v53  ;;  %v1166_v7 = vpack.c.bf16 %v1162_v51, %v1162_v51  ;;  %v2537_v51 = vld [vmem:[#allocation30_spill] sm:$0xff] }
 0x2ea   :  { %1218 = vmatpush1.bf16.msra.mxu0 %v1790_v3  ;;  %v860_v56 = vpack.c.b16 %v858_v39, %v858_v39  ;;  %v1210_v0 = vsel %vm99_vm2, %v1208_v37, %v1206_v47  ;;  %v1263_v32 = vunpack.c.l.b16 %v1168_v60  ;;  %v2534_v37 = vld [vmem:[#allocation19_spill] sm:$0xff] }
 0x2eb   :  { %1219 = vmatprep.subr.bf16.mxu0 %v1814_v12  ;;  %v1212_v2 = vpack.c.b16 %v1210_v0, %v1210_v0  ;;  %v1261_v59 = vunpack.c.l.b16 %v1166_v7  ;;  %v2536_v47 = vld [vmem:[#allocation23_spill] sm:$0xff]  ;;  %v2538_v0 = vld [vmem:[#allocation24_spill] sm:$0xff] }
 0x2ec   :  { %1055 = vmatprep.mubr.bf16.mxu1 %v860_v56  ;;  %v2539_v7 = vld [vmem:[#allocation31_spill] sm:$0xff] }
 0x2ed   :  { %1056 = vmatmul.mubr.bf16.vlgmr.msra.gmra.mxu1 %v859_v48  ;;  %1247 = vmatprep.mubr.bf16.mxu0 %v1212_v2  ;;  %v1265_v35 = vsel %vm99_vm2, %v1263_v32, %v1261_v59  ;;  %v2540_v2 = vld [vmem:[#allocation28_spill] sm:$0xff]  ;;  %v2541_v32 = vld [vmem:[#allocation34_spill] sm:$0xff] }
 0x2ee   :  { %1271 = vmatpush1.bf16.msra.mxu1 %v1779_v62  ;;  %1220 = vmatpush1.bf16.msra.mxu0 %v1820_v13  ;;  %v1267_v3 = vpack.c.b16 %v1265_v35, %v1265_v35  ;;  %v40_v62 = vld [vmem:[%s2399_s1 + $0x30] sm:$0xff]  ;;  %v34_v13 = vld [vmem:[%s2399_s1] sm:$0xff] }
 0x2ef   :  { %1272 = vmatprep.subr.bf16.mxu1 %v1809_v11  ;;  %1221 = vmatprep.subr.bf16.mxu0 %v1838_v16  ;;  %v38_v11 = vld [vmem:[%s2399_s1 + $0x20] sm:$0xff]  ;;  %v2274_v12 = vmul.f32 %v2228_v8, %v40_v62  ;;  %v2290_v16 = vmul.f32 %v2203_v6, %v34_v13  ;;  %v2542_v62 = vld [vmem:[#allocation29_spill] sm:$0xff]  ;;  %v2544_v13 = vld [vmem:[#allocation32_spill] sm:$0xff] }
 0x2f0   :  { %1302 = vmatprep.mubr.bf16.mxu1 %v1267_v3  ;;  %v2520_v6 = vld [vmem:[#allocation6_spill] sm:$0xff] }
 0x2f2   :  { %1273 = vmatpush1.bf16.msra.mxu1 %v1802_v10  ;;  %1222 = vmatpush1.bf16.msra.mxu0 %v1849_v18  ;;  %v36_v10 = vld [vmem:[%s2399_s1 + $0x10] sm:$0xff] }
 0x2f3   :  { %1274 = vmatprep.subr.bf16.mxu1 %v1825_v14  ;;  %1223 = vmatprep.subr.bf16.mxu0 %v1862_v20  ;;  %v2280_v14 = vmul.f32 %v2221_v49, %v38_v11  ;;  %v2515_v20 = vld [vmem:[#allocation5_spill] sm:$0xff]  ;;  %v2518_v49 = vld [vmem:[#allocation4_spill] sm:$0xff]  ;;  %v2543_v11 = vld [vmem:[#allocation35_spill] sm:$0xff] }
 0x2f6   :  { %1275 = vmatpush1.bf16.msra.mxu1 %v1831_v15  ;;  %1224 = vmatpush1.bf16.msra.mxu0 %v1873_v23  ;;  %v2283_v15 = vmul.f32 %v2201_v5, %v36_v10  ;;  %v2517_v23 = vld [vmem:[#allocation8_spill] sm:$0xff]  ;;  %v2519_v5 = vld [vmem:[#allocation10_spill] sm:$0xff] }
 0x2f7   :  { %1276 = vmatprep.subr.bf16.mxu1 %v1844_v17  ;;  %1225 = vmatprep.subr.bf16.mxu0 %v1886_v25  ;;  %v1183_v17 = vmax.f32 %v2280_v14, %v2274_v12 }
 0x2f8   :  { %v1169_v18 = vmax.f32 %v2290_v16, %v2283_v15 }
 0x2f9   :  { %v1184_v25 = vrot.slane %v1183_v17, 4 }
 0x2fa   :  { %1277 = vmatpush1.bf16.msra.mxu1 %v1855_v19  ;;  %1226 = vmatpush1.bf16.msra.mxu0 %v1897_v27  ;;  %v2516_v19 = vld [vmem:[#allocation3_spill] sm:$0xff]  ;;  %v1133_v27 = vadd.f32 %v2283_v15, %v2290_v16 }
 0x2fb   :  { %1278 = vmatprep.subr.bf16.mxu1 %v1868_v22  ;;  %1227 = vmatprep.subr.bf16.mxu0 %v1910_v29  ;;  %v1147_v22 = vadd.f32 %v2274_v12, %v2280_v14  ;;  %v1170_v29 = vrot.slane %v1169_v18, 4  ;;  %v1185_v61 = vmax.f32 %v1183_v17, %v1184_v25  ;;  %v2545_v17 = vld [vmem:[#allocation38_spill] sm:$0xff] }
 0x2fc   :  { %v1134_v40 = vrot.slane %v1133_v27, 4 }
 0x2fd   :  { %v1148_v8 = vrot.slane %v1147_v22, 4  ;;  %v1171_v34 = vmax.f32 %v1169_v18, %v1170_v29  ;;  %v1186_v30 = vrot.slane %v1185_v61, 2  ;;  %v2549_v29 = vld [vmem:[#allocation42_spill] sm:$0xff] }
 0x2fe   :  { %1279 = vmatpush1.bf16.msra.mxu1 %v1879_v24  ;;  %1228 = vmatpush1.bf16.msra.mxu0 %v2515_v20  ;;  %v2521_v24 = vld [vmem:[#allocation12_spill] sm:$0xff]  ;;  %v1135_v31 = vadd.f32 %v1134_v40, %v1133_v27 }
 0x2ff   :  { %1280 = vmatprep.subr.bf16.mxu1 %v2516_v19  ;;  %1229 = vmatprep.subr.bf16.mxu0 %v2517_v23  ;;  %v1149_v55 = vadd.f32 %v1148_v8, %v1147_v22  ;;  %v1172_v28 = vrot.slane %v1171_v34, 2  ;;  %v1187_v21 = vmax.f32 %v1185_v61, %v1186_v30  ;;  %v2546_v23 = vld [vmem:[#allocation33_spill] sm:$0xff]  ;;  %v2547_v22 = vld [vmem:[#allocation39_spill] sm:$0xff]  ;;  %v2548_v27 = vld [vmem:[#allocation36_spill] sm:$0xff] }
 0x300   :  { %v1136_v9 = vrot.slane %v1135_v31, 2  ;;  %v2552_v61 = vld [vmem:[#allocation40_spill] sm:$0xff] }
 0x301   :  { %v1150_v63 = vrot.slane %v1149_v55, 2  ;;  %v1173_v45 = vmax.f32 %v1171_v34, %v1172_v28  ;;  %v1188_v36 = vrot.slane %v1187_v21, 1 }
 0x302   :  { %1281 = vmatpush1.bf16.msra.mxu1 %v2518_v49  ;;  %1230 = vmatpush1.bf16.msra.mxu0 %v2519_v5  ;;  %v1137_v53 = vadd.f32 %v1136_v9, %v1135_v31 }
 0x303   :  { %1282 = vmatprep.subr.bf16.mxu1 %v2520_v6  ;;  %1231 = vmatprep.subr.bf16.mxu0 %v2521_v24  ;;  %v1151_v46 = vadd.f32 %v1150_v63, %v1149_v55  ;;  %v1174_v38 = vrot.slane %v1173_v45, 1  ;;  %v1189_v48 = vmax.f32 %v1187_v21, %v1188_v36  ;;  %v2550_v6 = vld [vmem:[#allocation37_spill] sm:$0xff]  ;;  %v2551_v24 = vld [vmem:[#allocation43_spill] sm:$0xff] }
 0x304   :  { %v1138_v60 = vrot.slane %v1137_v53, 1  ;;  %v2555_v55 = vld [vmem:[#allocation45_spill] sm:$0xff] }
 0x305   :  { %v1152_v39 = vrot.slane %v1151_v46, 1  ;;  %v1175_v56 = vmax.f32 %v1173_v45, %v1174_v38  ;;  %v1199_v35 = vpack.c.bf16 %v1189_v48, %v1189_v48 }
 0x306   :  { %1283 = vmatpush1.bf16.msra.mxu1 %v2522_v43  ;;  %1232 = vmatpush2.bf16.msra.mxu0 %v2523_v4  ;;  %v1139_v3 = vadd.f32 %v1138_v60, %v1137_v53  ;;  %v2553_v43 = vld [vmem:[#allocation41_spill] sm:$0xff] }
 0x307   :  { %1284 = vmatprep.subr.bf16.mxu1 %v2524_v50  ;;  %1233 = vmatprep.subr.bf16.mxu0 %v2525_v54  ;;  %v1153_v59 = vadd.f32 %v1152_v39, %v1151_v46  ;;  %v1197_v10 = vpack.c.bf16 %v1175_v56, %v1175_v56  ;;  %v1207_v20 = vunpack.c.l.b16 %v1199_v35  ;;  %v2554_v50 = vld [vmem:[#allocation44_spill] sm:$0xff] }
 0x308   :  { %v1161_v19 = vmul.f32 0.0625, %v1139_v3 }
 0x309   :  { %v1163_v18 = vmul.f32 0.0625, %v1153_v59  ;;  %v1205_v25 = vunpack.c.l.b16 %v1197_v10 }
 0x30a   :  { %1285 = vmatpush1.bf16.msra.mxu1 %v2526_v33  ;;  %1234 = vmatpush2.bf16.msra.mxu0 %v2527_v26  ;;  %v1165_v8 = vpack.c.bf16 %v1161_v19, %v1161_v19 }
 0x30b   :  { %1286 = vmatprep.subr.bf16.mxu1 %v2528_v58  ;;  %1235 = vmatprep.subr.bf16.mxu0 %v2529_v57  ;;  %v1167_v49 = vpack.c.bf16 %v1163_v18, %v1163_v18  ;;  %v1209_v5 = vsel %vm99_vm2, %v1207_v20, %v1205_v25 }
 0x30c   :  { %v1211_v40 = vpack.c.b16 %v1209_v5, %v1209_v5  ;;  %v1260_v4 = vunpack.c.l.b16 %v1165_v8 }
 0x30d   :  { %v1262_v34 = vunpack.c.l.b16 %v1167_v49 }
 0x30e   :  { %1287 = vmatpush2.bf16.msra.mxu1 %v2530_v52  ;;  %1236 = vmatpush2.bf16.msra.mxu0 %v2531_v41 }
 0x30f   :  { %1288 = vmatprep.subr.bf16.mxu1 %v2532_v1  ;;  %1237 = vmatprep.subr.bf16.mxu0 %v2533_v44  ;;  %v1264_v54 = vsel %vm99_vm2, %v1262_v34, %v1260_v4 }
 0x310   :  { %v1266_v30 = vpack.c.b16 %v1264_v54, %v1264_v54 }
 0x312   :  { %1289 = vmatpush2.bf16.msra.mxu1 %v2534_v37  ;;  %1238 = vmatpush2.bf16.msra.mxu0 %v2535_v42 }
 0x313   :  { %1290 = vmatprep.subr.bf16.mxu1 %v2536_v47  ;;  %1239 = vmatprep.subr.bf16.mxu0 %v2537_v51 }
 0x316   :  { %1291 = vmatpush2.bf16.msra.mxu1 %v2538_v0  ;;  %1240 = vmatpush2.bf16.msra.mxu0 %v2539_v7 }
 0x317   :  { %1292 = vmatprep.subr.bf16.mxu1 %v2540_v2  ;;  %1241 = vmatprep.subr.bf16.mxu0 %v2541_v32 }
 0x31a   :  { %1293 = vmatpush2.bf16.msra.mxu1 %v2542_v62  ;;  %1242 = vmatpush2.bf16.msra.mxu0 %v2543_v11 }
 0x31b   :  { %1294 = vmatprep.subr.bf16.mxu1 %v2544_v13  ;;  %1243 = vmatprep.subr.bf16.mxu0 %v2545_v17 }
 0x31e   :  { %1295 = vmatpush2.bf16.msra.mxu1 %v2546_v23  ;;  %1244 = vmatpush2.bf16.msra.mxu0 %v2547_v22 }
 0x31f   :  { %1296 = vmatprep.subr.bf16.mxu1 %v2548_v27  ;;  %1245 = vmatprep.subr.bf16.mxu0 %v2549_v29  ;;  %v1643_v29 = vmov 1966171168  }
 0x320   :  { %v1084_v49 = vunpack.c.l.s4 %v1643_v29 }
 0x322   :  { %1297 = vmatpush2.bf16.msra.mxu1 %v2550_v6  ;;  %1246 = vmatpush2.bf16.msra.mxu0 %v2551_v24  ;;  %v1085_v5 = vunpack.c.0.s8 %v1084_v49  ;;  %v2556_v6 = vld [vmem:[#allocation2_spill] sm:$0xff] }
 0x323   :  { %1298 = vmatprep.subr.bf16.mxu1 %v2552_v61 }
 0x324   :  { %v1088_v24 = vsub.s32 %v1085_v5, %v2556_v6 }
 0x325   :  { %1248 = vmatmul.mubr.bf16.vlgmr.msra.gmra.mxu0 %v1211_v40 }
 0x326   :  { %1299 = vmatpush2.bf16.msra.mxu1 %v2553_v43 }
 0x327   :  { %1300 = vmatprep.subr.bf16.mxu1 %v2554_v50 }
 0x32a   :  { %1301 = vmatpush2.bf16.msra.mxu1 %v2555_v55 }
 0x32d   :  { %1303 = vmatmul.mubr.bf16.vlgmr.msra.gmra.mxu1 %v1266_v30 }
 0x3a5   :  { %v842_v31 = vpop.f32.mrf.mxu0 }
 0x3a7   :  { %v844_v28 = vpop.f32.mrf.mxu0 }
 0x3a9   :  { %v846_v33 = vpop.f32.mrf.mxu0 }
 0x3ab   :  { %v847_v26 = vpop.f32.mrf.mxu0 }
 0x3ac   :  { %v2557_v26 = vld [vmem:[#allocation21_spill] sm:$0xff] }
 0x3ad   :  { %v1057_v58 = vpop.f32.mrf.mxu1 }
 0x3ae   :  { %v1058_v57 = vadd.f32 %v1057_v58, %v842_v31 }
 0x3af   :  { %v1059_v63 = vpop.f32.mrf.mxu1 }
 0x3b0   :  { %v1064_v21 = vsub.f32 0.0, %v1058_v57  ;;  %v1060_v9 = vadd.f32 %v1059_v63, %v844_v28  ;;  %v2558_v57 = vld [vmem:[#allocation26_spill] sm:$0xff] }
 0x3b1   :  { %v1061_v45 = vpop.f32.mrf.mxu1 }
 0x3b2   :  { %v1066_v52 = vmul.f32 1.442695, %v1064_v21  ;;  %v1065_v41 = vsub.f32 0.0, %v1060_v9 }
 0x3b3   :  { %v1062_v1 = vpop.f32.mrf.mxu1 }
 0x3b4   :  { %1625 = vpow2.f32 %v1066_v52  ;;  %v1068_v44 = vmul.f32 1.442695, %v1065_v41  ;;  %v2559_v1 = vld [vmem:[#allocation47_spill] sm:$0xff] }
 0x3b6   :  { %1627 = vpow2.f32 %v1068_v44 }
 0x3c1   :  { %v1626_v46 = vpop.eup %1625 }
 0x3c2   :  { %v1070_v36 = vadd.f32 1.0, %v1626_v46  ;;  %v2560_v46 = vld [vmem:[#allocation49_spill] sm:$0xff] }
 0x3c3   :  { %v1628_v53 = vpop.eup %1627 }
 0x3c4   :  { %1629 = vrcp.f32 %v1070_v36  ;;  %v1071_v38 = vadd.f32 1.0, %v1628_v53 }
 0x3c6   :  { %1631 = vrcp.f32 %v1071_v38 }
 0x3d1   :  { %v1630_v37 = vpop.eup %1629 }
 0x3d2   :  { %v1480_v42 = vadd.f32 -1.0, %v1630_v37 }
 0x3d3   :  { %v1632_v47 = vpop.eup %1631 }
 0x3d4   :  { %v1076_v51 = vmul.f32 0.0625, %v1480_v42  ;;  %v1481_v39 = vadd.f32 -1.0, %v1632_v47  ;;  %v2561_v42 = vld [vmem:[#allocation46_spill] sm:$0xff] }
 0x3d6   :  { %v1077_v48 = vmul.f32 0.0625, %v1481_v39  ;;  %v1078_v60 = vadd.f32 1.0, %v1076_v51  ;;  %v2562_v51 = vld [vmem:[#allocation48_spill] sm:$0xff] }
 0x3d8   :  { %v1079_v56 = vadd.f32 1.0, %v1077_v48  ;;  %v2563_v48 = vld [vmem:[#allocation50_spill] sm:$0xff] }
 0x3da   :  { %v1082_v0 = vcombine.low %v1078_v60, %v1079_v56  ;;  %v2564_v56 = vld [vmem:[#allocation51_spill] sm:$0xff] }
 0x3dc   :  { %v1089_v61 = vrot.slane %v1082_v0, %v1088_v24 }
 0x3de   :  { %v1090_v50 = vcombine.high %v1089_v61, %v1089_v61  ;;  %v1097_v55 = vrot.slane %v1089_v61, %v1088_v24 }
 0x3e0   :  { %v1104_v28 = vrot.slane %v1090_v50, %v1088_v24  ;;  %v1108_v58 = vrot.slane %v1097_v55, %v2557_v26  ;;  %v1112_v63 = vrot.slane %v1097_v55, %v2558_v57 }
 0x3e2   :  { %v1116_v9 = vrot.slane %v1104_v28, %v2557_v26  ;;  %v1120_v45 = vrot.slane %v1104_v28, %v2558_v57  ;;  %v1125_v44 = vmul.f32 %v1108_v58, %v2559_v1  ;;  %v1126_v36 = vmul.f32 %v1112_v63, %v2560_v46 }
 0x3e3   :  { %v1127_v47 = vmul.f32 %v1108_v58, %v2561_v42  ;;  %v1128_v39 = vmul.f32 %v1112_v63, %v2562_v51 }
 0x3e4   :  { %v1129_v60 = vmul.f32 %v1116_v9, %v2563_v48  ;;  %v1130_v0 = vmul.f32 %v1120_v45, %v2564_v56 }
 0x3e5   :  { %v1249_v7 = vpop.f32.mrf.mxu0 }
 0x3e7   :  { %v1251_v2 = vpop.f32.mrf.mxu0 }
 0x3e9   :  { %v1253_v32 = vpop.f32.mrf.mxu0 }
 0x3eb   :  { %v1254_v59 = vpop.f32.mrf.mxu0 }
 0x3ec   :  { %v2565_v59 = vld [vmem:[#allocation55_spill] sm:$0xff] }
 0x3ed   :  { %v1304_v35 = vpop.f32.mrf.mxu1 }
 0x3ee   :  { %v1305_v3 = vadd.f32 %v1304_v35, %v1249_v7 }
 0x3ef   :  { %v1306_v62 = vpop.f32.mrf.mxu1 }
 0x3f0   :  { %v1311_v11 = vsub.f32 0.0, %v1305_v3  ;;  %v1307_v10 = vadd.f32 %v1306_v62, %v1251_v2  ;;  %v2566_v3 = vld [vmem:[#allocation52_spill] sm:$0xff] }
 0x3f1   :  { %v1308_v13 = vpop.f32.mrf.mxu1  ;;  %v1131_v62 = vmul.f32 %v1116_v9, %v2566_v3 }
 0x3f2   :  { %v1313_v17 = vmul.f32 1.442695, %v1311_v11  ;;  %v1312_v18 = vsub.f32 0.0, %v1307_v10  ;;  %v2567_v11 = vld [vmem:[#allocation53_spill] sm:$0xff] }
 0x3f3   :  { %v1309_v20 = vpop.f32.mrf.mxu1  ;;  %v1132_v10 = vmul.f32 %v1120_v45, %v2567_v11 }
 0x3f4   :  { %1633 = vpow2.f32 %v1313_v17  ;;  %v1315_v19 = vmul.f32 1.442695, %v1312_v18  ;;  %v2568_v17 = vld [vmem:[#allocation54_spill] sm:$0xff] }
 0x3f6   :  { %1635 = vpow2.f32 %v1315_v19  ;;  %v2569_v19 = vld [vmem:[#allocation56_spill] sm:$0xff] }
 0x401   :  { %v1634_v23 = vpop.eup %1633 }
 0x402   :  { %v1317_v22 = vadd.f32 1.0, %v1634_v23 }
 0x403   :  { %v1636_v25 = vpop.eup %1635 }
 0x404   :  { %1637 = vrcp.f32 %v1317_v22  ;;  %v1318_v27 = vadd.f32 1.0, %v1636_v25  ;;  %v2570_v25 = vld [vmem:[#allocation57_spill] sm:$0xff] }
 0x406   :  { %1639 = vrcp.f32 %v1318_v27 }
 0x411   :  { %v1638_v8 = vpop.eup %1637 }
 0x412   :  { %v1482_v40 = vadd.f32 -1.0, %v1638_v8 }
 0x413   :  { %v1640_v34 = vpop.eup %1639 }
 0x414   :  { %v1323_v43 = vmul.f32 0.0625, %v1482_v40  ;;  %v1483_v4 = vadd.f32 -1.0, %v1640_v34 }
 0x416   :  { %v1324_v54 = vmul.f32 0.0625, %v1483_v4  ;;  %v1325_v30 = vadd.f32 1.0, %v1323_v43 }
 0x418   :  { %v1326_v31 = vadd.f32 1.0, %v1324_v54 }
 0x41a   :  { %v1329_v33 = vcombine.low %v1325_v30, %v1326_v31 }
 0x41c   :  { %v1336_v21 = vrot.slane %v1329_v33, %v1088_v24 }
 0x41e   :  { %v1337_v52 = vcombine.high %v1336_v21, %v1336_v21  ;;  %v1344_v41 = vrot.slane %v1336_v21, %v1088_v24 }
 0x420   :  { %v1351_v53 = vrot.slane %v1337_v52, %v1088_v24  ;;  %v1355_v38 = vrot.slane %v1344_v41, %v2557_v26  ;;  %v1359_v37 = vrot.slane %v1344_v41, %v2558_v57 }
 0x422   :  { %v1363_v7 = vrot.slane %v1351_v53, %v2557_v26  ;;  %v1367_v2 = vrot.slane %v1351_v53, %v2558_v57  ;;  %v1372_v32 = vmul.f32 %v1355_v38, %v2290_v16  ;;  %v1373_v35 = vmul.f32 %v1359_v37, %v2565_v59 }
 0x423   :  { %v1374_v13 = vmul.f32 %v1355_v38, %v2283_v15  ;;  %v1375_v18 = vmul.f32 %v1359_v37, %v2568_v17 }
 0x424   :  { %v1376_v20 = vmul.f32 %v1363_v7, %v2280_v14  ;;  %v1377_v23 = vmul.f32 %v1367_v2, %v2569_v19  ;;  %v1378_v22 = vmul.f32 %v1363_v7, %v2274_v12  ;;  %v1379_v27 = vmul.f32 %v1367_v2, %v2570_v25 }
 0x425   :  { %v1380_v29 = vadd.f32 %v1372_v32, %v1125_v44  ;;  %v1381_v16 = vadd.f32 %v1373_v35, %v1126_v36  ;;  %v1382_v49 = vadd.f32 %v1374_v13, %v1127_v47  ;;  %v1383_v5 = vadd.f32 %v1375_v18, %v1128_v39 }
 0x426   :  { %v1384_v6 = vadd.f32 %v1376_v20, %v1129_v60  ;;  %v1385_v24 = vadd.f32 %v1377_v23, %v1130_v0  ;;  %v1386_v8 = vadd.f32 %v1378_v22, %v1131_v62  ;;  %v1387_v61 = vadd.f32 %v1379_v27, %v1132_v10 }
 0x427   :  { %v1388_v40 = vmul.f32 0.5, %v1380_v29  ;;  %v1389_v15 = vmul.f32 0.5, %v1381_v16  ;;  %v1390_v34 = vmul.f32 0.5, %v1382_v49  ;;  %v1391_v43 = vmul.f32 0.5, %v1383_v5 }
 0x428   :  { %v1392_v4 = vmul.f32 0.5, %v1384_v6  ;;  %v1393_v14 = vmul.f32 0.5, %v1385_v24  ;;  %v1394_v50 = vmul.f32 0.5, %v1386_v8  ;;  %v1395_v54 = vmul.f32 0.5, %v1387_v61 }
 0x429   :  { %1396 = vst [vmem:[%s2400_s7] sm:$0xff] %v1388_v40  ;;  %1397 = vst [vmem:[%s2400_s7 + $0x8] sm:$0xff] %v1389_v15 }
 0x42a   :  { %1398 = vst [vmem:[%s2400_s7 + $0x10] sm:$0xff] %v1390_v34  ;;  %1399 = vst [vmem:[%s2400_s7 + $0x18] sm:$0xff] %v1391_v43 }
 0x42b   :  { %1400 = vst [vmem:[%s2400_s7 + $0x20] sm:$0xff] %v1392_v4  ;;  %1401 = vst [vmem:[%s2400_s7 + $0x28] sm:$0xff] %v1393_v14 }
 0x42c   :  { %1402 = vst [vmem:[%s2400_s7 + $0x30] sm:$0xff] %v1394_v50  ;;  %1403 = vst [vmem:[%s2400_s7 + $0x38] sm:$0xff] %v1395_v54 }

</bundles_post_ra>
